<compile_context>
chip_gen: v5e
topology: v5e:2x2
jax: 0.10.0
libtpu: 0.0.40
codegen_flags: <defaults>
</compile_context>

<pallas_src>
import functools

import jax
import jax.numpy as jnp
import numpy as np
from jax.experimental import pallas as pl
from jax.experimental.pallas import tpu as pltpu


def _multicircle_loss_kernel(conf_ref, ploc_ref, gloc_ref, labels_ref,
                             reg_ref, cls_ref, npos_ref,
                             lhnm_col_ref,
                             *, neg_pos_ratio: int, tile_j: int):
    """One batch element per grid step; lane axis = priors P."""
    conf = conf_ref[...].astype(jnp.float32)        # (C, P)
    labels = labels_ref[...]                        # (1, P) int32
    C, P = conf.shape

    # ---- log-softmax over classes (sublane axis); background loss ----
    m = jnp.max(conf, axis=0, keepdims=True)                                   # (1, P)
    lse = m + jnp.log(jnp.sum(jnp.exp(conf - m), axis=0, keepdims=True))       # (1, P)
    bg_loss = lse - conf[0:1, :]                                               # (1, P)

    pos_mask = labels > 0                                                      # (1, P)
    num_pos = jnp.sum(pos_mask.astype(jnp.int32))                              # scalar
    num_neg = num_pos * neg_pos_ratio                                          # scalar

    loss_hnm = jnp.where(pos_mask, jnp.float32(-jnp.inf), bg_loss)             # (1, P)

    # Column copy of the mining loss so j-tiles can be sliced along sublanes.
    lhnm_col_ref[...] = jnp.reshape(loss_hnm, (P, 1))

    # rank[i] = #{ j : l[j] > l[i]  or  (l[j] == l[i] and j < i) }
    #         = position of i in a stable descending sort (== double argsort).
    idx_i = jax.lax.broadcasted_iota(jnp.int32, (1, P), 1)                     # (1, P)
    col_iota = jax.lax.broadcasted_iota(jnp.int32, (tile_j, 1), 0)             # (TJ, 1)
    n_tiles = P // tile_j

    def rank_body(jt, rank_acc):
        j0 = pl.multiple_of(jt * tile_j, tile_j)
        lj = lhnm_col_ref[pl.ds(j0, tile_j), :]                                # (TJ, 1)
        idx_j = col_iota + j0                                                  # (TJ, 1)
        gt_cnt = jnp.sum((lj > loss_hnm).astype(jnp.int32),
                         axis=0, keepdims=True)                                # (1, P)
        tie_cnt = jnp.sum(((lj == loss_hnm) & (idx_j < idx_i)).astype(jnp.int32),
                          axis=0, keepdims=True)                               # (1, P)
        return rank_acc + gt_cnt + tie_cnt

    rank = jax.lax.fori_loop(0, n_tiles, rank_body,
                             jnp.zeros((1, P), jnp.int32),
                             unroll=n_tiles <= 8)                              # (1, P)

    neg_mask = rank < num_neg
    mask = pos_mask | neg_mask                                                 # (1, P)

    # ---- classification loss: sum of cross-entropy over mined priors ----
    class_iota = jax.lax.broadcasted_iota(jnp.int32, (C, 1), 0)                # (C, 1)
    onehot = class_iota == labels                                              # (C, P) bool
    logit_at_label = jnp.sum(jnp.where(onehot, conf, 0.0),
                             axis=0, keepdims=True)                            # (1, P)
    ce = lse - logit_at_label                                                  # (1, P)
    cls_sum = jnp.sum(jnp.where(mask, ce, 0.0))

    # ---- smooth L1 (sum) over positive priors ----
    d = ploc_ref[...].astype(jnp.float32) - gloc_ref[...].astype(jnp.float32)  # (3, P)
    ad = jnp.abs(d)
    sl1 = jnp.sum(jnp.where(ad < 1.0, 0.5 * d * d, ad - 0.5),
                  axis=0, keepdims=True)                                       # (1, P)
    reg_sum = jnp.sum(jnp.where(pos_mask, sl1, 0.0))

    reg_ref[...] = jnp.reshape(reg_sum, (1, 1))
    cls_ref[...] = jnp.reshape(cls_sum, (1, 1))
    npos_ref[...] = jnp.reshape(num_pos.astype(jnp.float32), (1, 1))


def multicircle_loss(confidence, predicted_locations, labels, gt_locations,
                     neg_pos_ratio=3, tile_j=None):
    """Returns (smooth_l1_loss / num_pos, classification_loss / num_pos)."""
    B, P, C = confidence.shape

    # Lane-dense layout plumbing: put priors P on the last (lane) axis.
    conf_t = jnp.transpose(confidence, (0, 2, 1))              # (B, C, P)
    ploc_t = jnp.transpose(predicted_locations, (0, 2, 1))     # (B, 3, P)
    gloc_t = jnp.transpose(gt_locations, (0, 2, 1))            # (B, 3, P)
    labels3 = labels.astype(jnp.int32).reshape(B, 1, P)        # (B, 1, P)

    if tile_j is None:
        # Largest sublane-aligned divisor of P up to 512 lanes of work per step.
        candidates = [t for t in range(8, min(P, 512) + 1, 8) if P % t == 0]
        tile_j = max(candidates) if candidates else P
    tile_j = min(int(tile_j), P)
    if P % tile_j != 0:
        # TODO(synk): non-tile-divisible prior counts fall back to a single
        # j-tile (O(P^2) block live at once); pad P upstream for best perf.
        tile_j = P

    kernel = functools.partial(_multicircle_loss_kernel,
                               neg_pos_ratio=int(neg_pos_ratio),
                               tile_j=int(tile_j))

    batch_block = lambda b: (b, 0, 0)
    grid_spec = pltpu.PrefetchScalarGridSpec(
        num_scalar_prefetch=0,
        grid=(B,),
        in_specs=[
            pl.BlockSpec((None, C, P), batch_block),
            pl.BlockSpec((None, 3, P), batch_block),
            pl.BlockSpec((None, 3, P), batch_block),
            pl.BlockSpec((None, 1, P), batch_block),
        ],
        out_specs=(
            pl.BlockSpec((None, 1, 1), batch_block),
            pl.BlockSpec((None, 1, 1), batch_block),
            pl.BlockSpec((None, 1, 1), batch_block),
        ),
        scratch_shapes=[pltpu.VMEM((P, 1), jnp.float32)],
    )

    reg_b, cls_b, npos_b = pl.pallas_call(
        kernel,
        out_shape=(jax.ShapeDtypeStruct((B, 1, 1), jnp.float32),
                   jax.ShapeDtypeStruct((B, 1, 1), jnp.float32),
                   jax.ShapeDtypeStruct((B, 1, 1), jnp.float32)),
        grid_spec=grid_spec,
        compiler_params=pltpu.CompilerParams(
            dimension_semantics=("parallel",),
            # Sized so the (tile_j, P) comparison block + per-batch inputs fit
            # v7x's 64 MiB physical VMEM with headroom (v5e/v6e have 128 MiB).
            vmem_limit_bytes=48 * 1024 * 1024,
        ),
        cost_estimate=pl.CostEstimate(
            flops=3 * B * P * P + 12 * B * P * C,
            transcendentals=B * P * (C + 1),
            bytes_accessed=4 * B * P * (C + 3 + 3 + 1) + 3 * B * 4,
        ),
    )(conf_t, ploc_t, gloc_t, labels3)

    num_pos = jnp.sum(npos_b)
    # TODO(synk): like the PyTorch module, division by num_pos is unguarded when
    # there are zero positive priors in the batch (returns inf/nan).
    return jnp.sum(reg_b) / num_pos, jnp.sum(cls_b) / num_pos


def _reference_loss(conf, ploc, gloc, labels, ratio):
    """Plain-JAX replica of the PyTorch forward (correctness check)."""
    logsm = jax.nn.log_softmax(conf, axis=2)
    bg_loss = -logsm[:, :, 0]
    pos_mask = labels > 0
    num_pos = pos_mask.sum(axis=1, keepdims=True)
    num_neg = num_pos * ratio
    loss_h = jnp.where(pos_mask, -jnp.inf, bg_loss)
    idx = jnp.argsort(-loss_h, axis=1)        # descending, stable
    orders = jnp.argsort(idx, axis=1)
    neg_mask = orders < num_neg
    mask = pos_mask | neg_mask
    ce = -jnp.take_along_axis(logsm, labels[..., None], axis=2)[..., 0]
    cls = jnp.sum(jnp.where(mask, ce, 0.0))
    d = ploc - gloc
    ad = jnp.abs(d)
    sl1 = jnp.where(ad < 1.0, 0.5 * d * d, ad - 0.5).sum(axis=2)
    reg = jnp.sum(jnp.where(pos_mask, sl1, 0.0))
    n = pos_mask.sum().astype(jnp.float32)
    return reg / n, cls / n


if __name__ == "__main__":
    # Module "parameters" (from __init__) -- priors are unused in forward.
    B, P, C = 2, 256, 8
    iou_threshold = 0.5
    neg_pos_ratio = 3
    center_variance = 0.1   # unused in forward
    size_variance = 0.2     # unused in forward
    priors = jnp.linspace(0.0, 1.0, P * 3, dtype=jnp.float32).reshape(P, 3)

    key = jax.random.PRNGKey(0)
    k1, k2, k3, k4, k5 = jax.random.split(key, 5)
    confidence = jax.random.normal(k1, (B, P, C), dtype=jnp.float32)
    predicted_locations = jax.random.normal(k2, (B, P, 3), dtype=jnp.float32)
    gt_locations = jax.random.normal(k3, (B, P, 3), dtype=jnp.float32)
    # labels: mostly background (0), some positives in [1, C)
    labels = jax.random.randint(k4, (B, P), minval=0, maxval=C, dtype=jnp.int32)
    labels = jnp.where(jax.random.uniform(k5, (B, P)) < 0.75, 0, labels)
    labels = labels.at[:, 0].set(1)   # guarantee at least one positive per row

    reg_loss, cls_loss = multicircle_loss(
        confidence, predicted_locations, labels, gt_locations,
        neg_pos_ratio=neg_pos_ratio, tile_j=128)   # 128 -> exercises 2 j-tiles
    reg_loss = jax.block_until_ready(reg_loss)
    cls_loss = jax.block_until_ready(cls_loss)

    ref_reg, ref_cls = _reference_loss(
        confidence, predicted_locations, gt_locations, labels, neg_pos_ratio)

    np.testing.assert_allclose(np.asarray(reg_loss), np.asarray(ref_reg),
                               rtol=1e-4, atol=1e-5)
    np.testing.assert_allclose(np.asarray(cls_loss), np.asarray(ref_cls),
                               rtol=1e-4, atol=1e-5)
    print("KERNEL_OK")
</pallas_src>

<mosaic_0001>
module attributes {stable_mosaic.version = 11 : i64} {
  func.func @_multicircle_loss_kernel(%arg0: i32, %arg1: memref<1x8x256xf32, #tpu.memory_space<vmem>>, %arg2: memref<1x3x256xf32, #tpu.memory_space<vmem>>, %arg3: memref<1x3x256xf32, #tpu.memory_space<vmem>>, %arg4: memref<1x1x256xi32, #tpu.memory_space<vmem>>, %arg5: memref<1x1x1xf32, #tpu.memory_space<vmem>>, %arg6: memref<1x1x1xf32, #tpu.memory_space<vmem>>, %arg7: memref<1x1x1xf32, #tpu.memory_space<vmem>>, %arg8: memref<256x1xf32, #tpu.memory_space<vmem>>) attributes {dimension_semantics = [#tpu.dimension_semantics<parallel>], iteration_bounds = array<i64: 2>, scalar_prefetch = 0 : i64, scratch_operands = 1 : i64, tpu.core_type = #tpu.core_type<tc>, window_params = [{transform_indices = @transform_0, window_bounds = array<i64: 1, 8, 256>}, {transform_indices = @transform_1, window_bounds = array<i64: 1, 3, 256>}, {transform_indices = @transform_2, window_bounds = array<i64: 1, 3, 256>}, {transform_indices = @transform_3, window_bounds = array<i64: 1, 1, 256>}, {transform_indices = @transform_4, window_bounds = array<i64: 1, 1, 1>}, {transform_indices = @transform_5, window_bounds = array<i64: 1, 1, 1>}, {transform_indices = @transform_6, window_bounds = array<i64: 1, 1, 1>}]} {
    %c0 = arith.constant 0 : index
    %c0_0 = arith.constant 0 : index
    %c0_1 = arith.constant 0 : index
    %0 = vector.load %arg1[%c0, %c0_0, %c0_1] : memref<1x8x256xf32, #tpu.memory_space<vmem>>, vector<1x8x256xf32>
    %1 = vector.shape_cast %0 : vector<1x8x256xf32> to vector<8x256xf32>
    %c0_2 = arith.constant 0 : index
    %c0_3 = arith.constant 0 : index
    %c0_4 = arith.constant 0 : index
    %2 = vector.load %arg4[%c0_2, %c0_3, %c0_4] : memref<1x1x256xi32, #tpu.memory_space<vmem>>, vector<1x1x256xi32>
    %3 = vector.shape_cast %2 : vector<1x1x256xi32> to vector<1x256xi32>
    %cst = arith.constant dense<0xFF800000> : vector<256xf32>
    %4 = vector.multi_reduction <maximumf>, %1, %cst [0] : vector<8x256xf32> to vector<256xf32>
    %5 = vector.shape_cast %4 : vector<256xf32> to vector<1x256xf32>
    %6 = vector.broadcast %5 : vector<1x256xf32> to vector<8x256xf32>
    %7 = arith.subf %1, %6 : vector<8x256xf32>
    %8 = math.exp %7 : vector<8x256xf32>
    %cst_5 = arith.constant dense<0.000000e+00> : vector<256xf32>
    %9 = vector.multi_reduction <add>, %8, %cst_5 [0] : vector<8x256xf32> to vector<256xf32>
    %10 = vector.shape_cast %9 : vector<256xf32> to vector<1x256xf32>
    %11 = math.log %10 : vector<1x256xf32>
    %12 = arith.addf %5, %11 : vector<1x256xf32>
    %13 = vector.extract_strided_slice %1 {offsets = [0, 0], sizes = [1, 256], strides = [1, 1]} : vector<8x256xf32> to vector<1x256xf32>
    %14 = arith.subf %12, %13 : vector<1x256xf32>
    %c0_i32 = arith.constant 0 : i32
    %15 = vector.broadcast %c0_i32 : i32 to vector<1x256xi32>
    %16 = arith.cmpi sgt, %3, %15 : vector<1x256xi32>
    %17 = arith.extui %16 : vector<1x256xi1> to vector<1x256xi32>
    %18 = vector.shape_cast %17 : vector<1x256xi32> to vector<1x1x256xi32>
    %cst_6 = arith.constant dense<0> : vector<1xi32>
    %19 = vector.multi_reduction <add>, %18, %cst_6 [1, 2] : vector<1x1x256xi32> to vector<1xi32>
    %20 = vector.shape_cast %19 : vector<1xi32> to vector<1x1x1xi32>
    %21 = vector.extract %20[0, 0, 0] : i32 from vector<1x1x1xi32>
    %c3_i32 = arith.constant 3 : i32
    %22 = arith.muli %21, %c3_i32 : i32
    %cst_7 = arith.constant 0xFF800000 : f32
    %23 = vector.broadcast %cst_7 : f32 to vector<1x256xf32>
    %24 = arith.select %16, %23, %14 : vector<1x256xi1>, vector<1x256xf32>
    %25 = vector.shape_cast %24 : vector<1x256xf32> to vector<256x1xf32>
    %c0_8 = arith.constant 0 : index
    %c0_9 = arith.constant 0 : index
    %26 = vector.load %arg8[%c0_8, %c0_9] : memref<256x1xf32, #tpu.memory_space<vmem>>, vector<256x1xf32>
    tpu.vector_store %arg8[%c0_8, %c0_9], %25 {strides = array<i32>} : memref<256x1xf32, #tpu.memory_space<vmem>>, vector<256x1xf32>,
    %27 = tpu.iota {dimensions = array<i32: 1>} : vector<1x256xi32>
    %28 = tpu.iota {dimensions = array<i32: 0>} : vector<128x1xi32>
    %c0_i32_10 = arith.constant 0 : i32
    %29 = vector.broadcast %c0_i32_10 : i32 to vector<1x256xi32>
    %c0_i32_11 = arith.constant 0 : i32
    %c128_i32 = arith.constant 128 : i32
    %30 = arith.muli %c0_i32_11, %c128_i32 : i32
    %31 = tpu.assume_multiple %30, 128 : i32
    %32 = arith.index_cast %31 : i32 to index
    %c0_12 = arith.constant 0 : index
    %33 = vector.load %arg8[%32, %c0_12] : memref<256x1xf32, #tpu.memory_space<vmem>>, vector<128x1xf32>
    %34 = vector.broadcast %31 : i32 to vector<128x1xi32>
    %35 = arith.addi %28, %34 : vector<128x1xi32>
    %36 = vector.broadcast %33 : vector<128x1xf32> to vector<128x256xf32>
    %37 = vector.broadcast %24 : vector<1x256xf32> to vector<128x256xf32>
    %38 = arith.cmpf ogt, %36, %37 : vector<128x256xf32>
    %39 = arith.extui %38 : vector<128x256xi1> to vector<128x256xi32>
    %cst_13 = arith.constant dense<0> : vector<256xi32>
    %40 = vector.multi_reduction <add>, %39, %cst_13 [0] : vector<128x256xi32> to vector<256xi32>
    %41 = vector.shape_cast %40 : vector<256xi32> to vector<1x256xi32>
    %42 = vector.broadcast %33 : vector<128x1xf32> to vector<128x256xf32>
    %43 = vector.broadcast %24 : vector<1x256xf32> to vector<128x256xf32>
    %44 = arith.cmpf oeq, %42, %43 : vector<128x256xf32>
    %45 = vector.broadcast %35 : vector<128x1xi32> to vector<128x256xi32>
    %46 = vector.broadcast %27 : vector<1x256xi32> to vector<128x256xi32>
    %47 = arith.cmpi slt, %45, %46 : vector<128x256xi32>
    %48 = arith.andi %44, %47 : vector<128x256xi1>
    %49 = arith.extui %48 : vector<128x256xi1> to vector<128x256xi32>
    %cst_14 = arith.constant dense<0> : vector<256xi32>
    %50 = vector.multi_reduction <add>, %49, %cst_14 [0] : vector<128x256xi32> to vector<256xi32>
    %51 = vector.shape_cast %50 : vector<256xi32> to vector<1x256xi32>
    %52 = arith.addi %29, %41 : vector<1x256xi32>
    %53 = arith.addi %52, %51 : vector<1x256xi32>
    %c1_i32 = arith.constant 1 : i32
    %c128_i32_15 = arith.constant 128 : i32
    %54 = arith.muli %c1_i32, %c128_i32_15 : i32
    %55 = tpu.assume_multiple %54, 128 : i32
    %56 = arith.index_cast %55 : i32 to index
    %c0_16 = arith.constant 0 : index
    %57 = vector.load %arg8[%56, %c0_16] : memref<256x1xf32, #tpu.memory_space<vmem>>, vector<128x1xf32>
    %58 = vector.broadcast %55 : i32 to vector<128x1xi32>
    %59 = arith.addi %28, %58 : vector<128x1xi32>
    %60 = vector.broadcast %57 : vector<128x1xf32> to vector<128x256xf32>
    %61 = vector.broadcast %24 : vector<1x256xf32> to vector<128x256xf32>
    %62 = arith.cmpf ogt, %60, %61 : vector<128x256xf32>
    %63 = arith.extui %62 : vector<128x256xi1> to vector<128x256xi32>
    %cst_17 = arith.constant dense<0> : vector<256xi32>
    %64 = vector.multi_reduction <add>, %63, %cst_17 [0] : vector<128x256xi32> to vector<256xi32>
    %65 = vector.shape_cast %64 : vector<256xi32> to vector<1x256xi32>
    %66 = vector.broadcast %57 : vector<128x1xf32> to vector<128x256xf32>
    %67 = vector.broadcast %24 : vector<1x256xf32> to vector<128x256xf32>
    %68 = arith.cmpf oeq, %66, %67 : vector<128x256xf32>
    %69 = vector.broadcast %59 : vector<128x1xi32> to vector<128x256xi32>
    %70 = vector.broadcast %27 : vector<1x256xi32> to vector<128x256xi32>
    %71 = arith.cmpi slt, %69, %70 : vector<128x256xi32>
    %72 = arith.andi %68, %71 : vector<128x256xi1>
    %73 = arith.extui %72 : vector<128x256xi1> to vector<128x256xi32>
    %cst_18 = arith.constant dense<0> : vector<256xi32>
    %74 = vector.multi_reduction <add>, %73, %cst_18 [0] : vector<128x256xi32> to vector<256xi32>
    %75 = vector.shape_cast %74 : vector<256xi32> to vector<1x256xi32>
    %76 = arith.addi %53, %65 : vector<1x256xi32>
    %77 = arith.addi %76, %75 : vector<1x256xi32>
    %c2_i32 = arith.constant 2 : i32
    %78 = vector.broadcast %22 : i32 to vector<1x256xi32>
    %79 = arith.cmpi slt, %77, %78 : vector<1x256xi32>
    %80 = arith.ori %16, %79 : vector<1x256xi1>
    %81 = tpu.iota {dimensions = array<i32: 0>} : vector<8x1xi32>
    %82 = vector.broadcast %81 : vector<8x1xi32> to vector<8x256xi32>
    %83 = vector.broadcast %3 : vector<1x256xi32> to vector<8x256xi32>
    %84 = arith.cmpi eq, %82, %83 : vector<8x256xi32>
    %cst_19 = arith.constant 0.000000e+00 : f32
    %85 = vector.broadcast %cst_19 : f32 to vector<8x256xf32>
    %86 = arith.select %84, %1, %85 : vector<8x256xi1>, vector<8x256xf32>
    %cst_20 = arith.constant dense<0.000000e+00> : vector<256xf32>
    %87 = vector.multi_reduction <add>, %86, %cst_20 [0] : vector<8x256xf32> to vector<256xf32>
    %88 = vector.shape_cast %87 : vector<256xf32> to vector<1x256xf32>
    %89 = arith.subf %12, %88 : vector<1x256xf32>
    %cst_21 = arith.constant 0.000000e+00 : f32
    %90 = vector.broadcast %cst_21 : f32 to vector<1x256xf32>
    %91 = arith.select %80, %89, %90 : vector<1x256xi1>, vector<1x256xf32>
    %92 = vector.shape_cast %91 : vector<1x256xf32> to vector<1x1x256xf32>
    %cst_22 = arith.constant dense<0.000000e+00> : vector<1xf32>
    %93 = vector.multi_reduction <add>, %92, %cst_22 [1, 2] : vector<1x1x256xf32> to vector<1xf32>
    %94 = vector.shape_cast %93 : vector<1xf32> to vector<1x1x1xf32>
    %95 = vector.extract %94[0, 0, 0] : f32 from vector<1x1x1xf32>
    %c0_23 = arith.constant 0 : index
    %c0_24 = arith.constant 0 : index
    %c0_25 = arith.constant 0 : index
    %96 = vector.load %arg2[%c0_23, %c0_24, %c0_25] : memref<1x3x256xf32, #tpu.memory_space<vmem>>, vector<1x3x256xf32>
    %97 = vector.shape_cast %96 : vector<1x3x256xf32> to vector<3x256xf32>
    %c0_26 = arith.constant 0 : index
    %c0_27 = arith.constant 0 : index
    %c0_28 = arith.constant 0 : index
    %98 = vector.load %arg3[%c0_26, %c0_27, %c0_28] : memref<1x3x256xf32, #tpu.memory_space<vmem>>, vector<1x3x256xf32>
    %99 = vector.shape_cast %98 : vector<1x3x256xf32> to vector<3x256xf32>
    %100 = arith.subf %97, %99 : vector<3x256xf32>
    %101 = math.absf %100 : vector<3x256xf32>
    %cst_29 = arith.constant 1.000000e+00 : f32
    %102 = vector.broadcast %cst_29 : f32 to vector<3x256xf32>
    %103 = arith.cmpf olt, %101, %102 : vector<3x256xf32>
    %cst_30 = arith.constant 5.000000e-01 : f32
    %104 = vector.broadcast %cst_30 : f32 to vector<3x256xf32>
    %105 = arith.mulf %104, %100 : vector<3x256xf32>
    %106 = arith.mulf %105, %100 : vector<3x256xf32>
    %cst_31 = arith.constant 5.000000e-01 : f32
    %107 = vector.broadcast %cst_31 : f32 to vector<3x256xf32>
    %108 = arith.subf %101, %107 : vector<3x256xf32>
    %109 = arith.select %103, %106, %108 : vector<3x256xi1>, vector<3x256xf32>
    %cst_32 = arith.constant dense<0.000000e+00> : vector<256xf32>
    %110 = vector.multi_reduction <add>, %109, %cst_32 [0] : vector<3x256xf32> to vector<256xf32>
    %111 = vector.shape_cast %110 : vector<256xf32> to vector<1x256xf32>
    %cst_33 = arith.constant 0.000000e+00 : f32
    %112 = vector.broadcast %cst_33 : f32 to vector<1x256xf32>
    %113 = arith.select %16, %111, %112 : vector<1x256xi1>, vector<1x256xf32>
    %114 = vector.shape_cast %113 : vector<1x256xf32> to vector<1x1x256xf32>
    %cst_34 = arith.constant dense<0.000000e+00> : vector<1xf32>
    %115 = vector.multi_reduction <add>, %114, %cst_34 [1, 2] : vector<1x1x256xf32> to vector<1xf32>
    %116 = vector.shape_cast %115 : vector<1xf32> to vector<1x1x1xf32>
    %117 = vector.extract %116[0, 0, 0] : f32 from vector<1x1x1xf32>
    %118 = vector.broadcast %117 : f32 to vector<1x1xf32>
    %c0_35 = arith.constant 0 : index
    %c0_36 = arith.constant 0 : index
    %c0_37 = arith.constant 0 : index
    %119 = vector.load %arg5[%c0_35, %c0_36, %c0_37] : memref<1x1x1xf32, #tpu.memory_space<vmem>>, vector<1x1x1xf32>
    %120 = vector.shape_cast %119 : vector<1x1x1xf32> to vector<1x1xf32>
    %121 = vector.shape_cast %118 : vector<1x1xf32> to vector<1x1x1xf32>
    tpu.vector_store %arg5[%c0_35, %c0_36, %c0_37], %121 {strides = array<i32>} : memref<1x1x1xf32, #tpu.memory_space<vmem>>, vector<1x1x1xf32>,
    %122 = vector.broadcast %95 : f32 to vector<1x1xf32>
    %c0_38 = arith.constant 0 : index
    %c0_39 = arith.constant 0 : index
    %c0_40 = arith.constant 0 : index
    %123 = vector.load %arg6[%c0_38, %c0_39, %c0_40] : memref<1x1x1xf32, #tpu.memory_space<vmem>>, vector<1x1x1xf32>
    %124 = vector.shape_cast %123 : vector<1x1x1xf32> to vector<1x1xf32>
    %125 = vector.shape_cast %122 : vector<1x1xf32> to vector<1x1x1xf32>
    tpu.vector_store %arg6[%c0_38, %c0_39, %c0_40], %125 {strides = array<i32>} : memref<1x1x1xf32, #tpu.memory_space<vmem>>, vector<1x1x1xf32>,
    %126 = arith.sitofp %21 : i32 to f32
    %127 = vector.broadcast %126 : f32 to vector<1x1xf32>
    %c0_41 = arith.constant 0 : index
    %c0_42 = arith.constant 0 : index
    %c0_43 = arith.constant 0 : index
    %128 = vector.load %arg7[%c0_41, %c0_42, %c0_43] : memref<1x1x1xf32, #tpu.memory_space<vmem>>, vector<1x1x1xf32>
    %129 = vector.shape_cast %128 : vector<1x1x1xf32> to vector<1x1xf32>
    %130 = vector.shape_cast %127 : vector<1x1xf32> to vector<1x1x1xf32>
    tpu.vector_store %arg7[%c0_41, %c0_42, %c0_43], %130 {strides = array<i32>} : memref<1x1x1xf32, #tpu.memory_space<vmem>>, vector<1x1x1xf32>,
    return
  }
  func.func @transform_0(%arg0: i32) -> (i32, i32, i32) {
    %c0_i32 = arith.constant 0 : i32
    %c0_i32_0 = arith.constant 0 : i32
    %c0_i32_1 = arith.constant 0 : i32
    return %arg0, %c0_i32, %c0_i32_0 : i32, i32, i32
  }
  func.func @transform_1(%arg0: i32) -> (i32, i32, i32) {
    %c0_i32 = arith.constant 0 : i32
    %c0_i32_0 = arith.constant 0 : i32
    %c0_i32_1 = arith.constant 0 : i32
    return %arg0, %c0_i32, %c0_i32_0 : i32, i32, i32
  }
  func.func @transform_2(%arg0: i32) -> (i32, i32, i32) {
    %c0_i32 = arith.constant 0 : i32
    %c0_i32_0 = arith.constant 0 : i32
    %c0_i32_1 = arith.constant 0 : i32
    return %arg0, %c0_i32, %c0_i32_0 : i32, i32, i32
  }
  func.func @transform_3(%arg0: i32) -> (i32, i32, i32) {
    %c0_i32 = arith.constant 0 : i32
    %c0_i32_0 = arith.constant 0 : i32
    %c0_i32_1 = arith.constant 0 : i32
    return %arg0, %c0_i32, %c0_i32_0 : i32, i32, i32
  }
  func.func @transform_4(%arg0: i32) -> (i32, i32, i32) {
    %c0_i32 = arith.constant 0 : i32
    %c0_i32_0 = arith.constant 0 : i32
    %c0_i32_1 = arith.constant 0 : i32
    return %arg0, %c0_i32, %c0_i32_0 : i32, i32, i32
  }
  func.func @transform_5(%arg0: i32) -> (i32, i32, i32) {
    %c0_i32 = arith.constant 0 : i32
    %c0_i32_0 = arith.constant 0 : i32
    %c0_i32_1 = arith.constant 0 : i32
    return %arg0, %c0_i32, %c0_i32_0 : i32, i32, i32
  }
  func.func @transform_6(%arg0: i32) -> (i32, i32, i32) {
    %c0_i32 = arith.constant 0 : i32
    %c0_i32_0 = arith.constant 0 : i32
    %c0_i32_1 = arith.constant 0 : i32
    return %arg0, %c0_i32, %c0_i32_0 : i32, i32, i32
  }
}

</mosaic_0001>

<bundles_post_ra>
// kernel: tpu_custom_call.1
= control target key start
LH: loop header
LB: loop body
LE: loop exit
PB: predicated region body
PF: predicated region fallthrough
CT: control target
= control target key end

     0   :  { %s1802_s21 = smov 0   ;;  %s2739_s0 = inlined_call_operand.vmem [shape: f32[2,8,256], index: 0, kind: input, shape index: {}]   ;;  %s2740_s1 = inlined_call_operand.vmem [shape: f32[2,3,256], index: 1, kind: input, shape index: {}]   ;;  %s2741_s2 = inlined_call_operand.vmem [shape: f32[2,3,256], index: 2, kind: input, shape index: {}]   ;;  %s2742_s3 = inlined_call_operand.vmem [shape: s32[2,1,256], index: 3, kind: input, shape index: {}]   ;;  %s2743_s4 = inlined_call_operand.vmem [shape: f32[2,1,1], index: 4, kind: output, shape index: {0}]   ;;  %s2744_s5 = inlined_call_operand.vmem [shape: f32[2,1,1], index: 5, kind: output, shape index: {1}]   ;;  %s2745_s6 = inlined_call_operand.vmem [shape: f32[2,1,1], index: 6, kind: output, shape index: {2}]  }
   0x1 LB: > { %s1680_s22 = sadd.s32 4294967295, %s1764_s21   ;;  %p1684_p0 = scmp.ge.s32.totalorder %s1764_s21, 1  ;;  %s1764_s21 = sphi %s1802_s21, %s17_s21  }
   0x2   : > { %p246_p1 = scmp.lt.s32.totalorder %s1764_s21, 3 }
   0x4   : > { %p247_p2 = pnand %p1684_p0, %p246_p1 }
   0x5   : > { %p294_p3 = scmp.lt.s32.totalorder (!%p247_p2), %s1680_s22, 1 }
   0x6   : > { %250 = sbr.rel (%p247_p2) target bundleno = 729 (0x2d9), region = 36 }
   0xb   : > { %v403_v0 = vlaneseq  ;;  %s2771_s22 = smov (!%p294_p3, %s1680_s22), 1  ;;  %vm2748_vm0 = vcmask 1040384   ;;  %v1766_v51 = vmov 0   ;;  %vm596_vm2 = vcmask 7168  }
   0xc   : > { %s1695_s23 = sshll.u32 %s2771_s22, 4  ;;  %s1691_s27 = sshll.u32 %s2771_s22, 1  ;;  %vm2746_vm3 = vcmask 0  }
   0xd   : > { %v1811_v1 = vshrl.u32 %v403_v0, 7  ;;  %s1823_s26 = scalar_lea.vmem %s2739_s0, %s1695_s23  ;;  %s1832_s30 = scalar_lea.vmem %s2742_s3, %s1691_s27 }
   0xe   : > { %v322_v3 = vld [vmem:[%s1823_s26] sm:$0xff]  ;;  %v323_v4 = vld [vmem:[%s1823_s26 + $0x8] sm:$0xff]  ;;  %s321_s11 = scalar_lea.vmem %s2745_s6, %s2771_s22  ;;  %s1696_s12 = sshll.u32 %s2771_s22, 3 }
   0xf   : > { %1713 = vset.pattern.permute.xlu1 %v1811_v1  ;;  %v1817_v2 = vadd.s32 16, %v1811_v1  ;;  %v325_v5 = vrot.slane %v322_v3, 4  ;;  %v331_v6 = vrot.slane %v323_v4, 4  ;;  %v1839_v41 = vld [vmem:[%s1832_s30] sm:$0x3]  ;;  %v1855_v49 = vadd.s32 24, %v1811_v1  ;;  %s303_s15 = scalar_lea.vmem %s2740_s1, %s1696_s12  ;;  %s308_s18 = scalar_lea.vmem %s2741_s2, %s1696_s12 }
  0x10   : > { %vm2747_vm1 = vcmp.gt.s32.totalorder %v1839_v41, 0  ;;  %v1858_v50 = vadd.s32 8, %v1811_v1  ;;  %v1870_v62 = vadd.s32 48, %v1811_v1  ;;  %v1873_v63 = vadd.s32 40, %v1811_v1  ;;  %s318_s24 = scalar_lea.vmem %s2744_s5, %s2771_s22  ;;  %s315_s28 = scalar_lea.vmem %s2743_s4, %s2771_s22 }
  0x11   : > { %1715 = vset.pattern.permute.xlu2 %v1817_v2  ;;  %v326_v7 = vmax.f32 %v322_v3, %v325_v5  ;;  %v332_v8 = vmax.f32 %v323_v4, %v331_v6  ;;  %v364_v52 = vsel %vm2747_vm1, 1, %v1766_v51  ;;  %v1887_v5 = vadd.s32 56, %v1811_v1 }
  0x12   : > { %v365_v53 = vperm.slane %v364_v52, 0  ;;  %v366_v54 = vperm.slane %v364_v52, 1  ;;  %v1895_v6 = vadd.s32 32, %v1811_v1 }
  0x13   : > { %v327_v9 = vrot.slane %v326_v7, 2  ;;  %v333_v10 = vrot.slane %v332_v8, 2 }
  0x14   : > { %v368_v55 = vsel %vm2748_vm0, %v365_v53, 0  ;;  %v369_v56 = vsel %vm2748_vm0, %v366_v54, 0 }
  0x15   : > { %v328_v11 = vmax.f32 %v326_v7, %v327_v9  ;;  %v334_v12 = vmax.f32 %v332_v8, %v333_v10  ;;  %v370_v57 = vadd.s32 %v369_v56, %v368_v55  ;;  %v1899_v7 = vadd.s32 80, %v1811_v1 }
  0x16   : > { %v1902_v8 = vadd.s32 72, %v1811_v1 }
  0x17   : > { %v329_v13 = vrot.slane %v328_v11, 1  ;;  %v335_v14 = vrot.slane %v334_v12, 1  ;;  %v371_v58 = vand.u32 65535, %v370_v57  ;;  %v372_v60 = vshrl.u32 %v370_v57, 16 }
  0x19   : > { %v330_v15 = vmax.f32 %v328_v11, %v329_v13  ;;  %v336_v16 = vmax.f32 %v334_v12, %v335_v14  ;;  %v373_v59 = vcvt.s32.f32 %v371_v58  ;;  %v374_v61 = vcvt.s32.f32 %v372_v60 }
  0x1a   : > { %v1916_v11 = vadd.s32 96, %v1811_v1  ;;  %v1919_v12 = vadd.s32 88, %v1811_v1  ;;  %v1928_v13 = vadd.s32 112, %v1811_v1  ;;  %v1931_v14 = vadd.s32 104, %v1811_v1 }
  0x1b   : > { %v337_v17 = vsub.f32 %v322_v3, %v330_v15  ;;  %v338_v18 = vsub.f32 %v323_v4, %v336_v16  ;;  %375 = vadd.xlane.f32.xlu0 %v373_v59 }
  0x1d   : > { %v339_v19 = vmul.f32 1.442695, %v337_v17  ;;  %v341_v20 = vmul.f32 1.442695, %v338_v18 }
  0x1f   : > { %1747 = vpow2.f32 %v339_v19 }
  0x20   : > { %1749 = vpow2.f32 %v341_v20 }
  0x23   : > { %377 = vadd.xlane.f32.xlu0 %v374_v61 }
  0x25   : > { %v1748_v21 = vpop.eup %1747 }
  0x26   : > { %v1750_v22 = vpop.eup %1749  ;;  %v343_v23 = vrot.slane %v1748_v21, 4 }
  0x27   : > { %v349_v24 = vrot.slane %v1750_v22, 4 }
  0x28   : > { %v344_v25 = vadd.f32 %v1748_v21, %v343_v23 }
  0x29   : > { %v350_v26 = vadd.f32 %v1750_v22, %v349_v24 }
  0x2a   : > { %v345_v27 = vrot.slane %v344_v25, 2 }
  0x2b   : > { %v351_v28 = vrot.slane %v350_v26, 2 }
  0x2c   : > { %v346_v29 = vadd.f32 %v345_v27, %v344_v25 }
  0x2d   : > { %v352_v30 = vadd.f32 %v351_v28, %v350_v26 }
  0x2e   : > { %v347_v31 = vrot.slane %v346_v29, 1 }
  0x2f   : > { %v353_v32 = vrot.slane %v352_v30, 1 }
  0x30   : > { %v348_v33 = vadd.f32 %v347_v31, %v346_v29 }
  0x31   : > { %v354_v34 = vadd.f32 %v353_v32, %v352_v30 }
  0x32   : > { %1751 = vlog2.f32 %v348_v33 }
  0x33   : > { %1753 = vlog2.f32 %v354_v34 }
  0x38   : > { %v1752_v35 = vpop.eup %1751 }
  0x39   : > { %v1754_v36 = vpop.eup %1753  ;;  %v356_v37 = vmul.f32 0.6931472, %v1752_v35 }
  0x3a   : > { %v358_v38 = vmul.f32 0.6931472, %v1754_v36 }
  0x3b   : > { %v1834_v39 = vadd.f32 %v356_v37, %v330_v15 }
  0x3c   : > { %v1836_v40 = vadd.f32 %v358_v38, %v336_v16 }
  0x3d   : > { %v361_v42 = vsub.f32 %v1834_v39, %v322_v3  ;;  %v1880_v3 = vadd.s32 120, %v1811_v1 }
  0x3e   : > { %v362_v43 = vsub.f32 %v1836_v40, %v323_v4  ;;  %v1884_v4 = vadd.s32 64, %v1811_v1 }
  0x3f   : > { %1727 = vset.pattern.permute.xlu0 %v1880_v3 }
  0x40   : > { %v393_v44 = vrot.slane %v362_v43, 7 }
  0x42   : > { %v394_v45 = vsel %vm2748_vm0, %v361_v42, %v393_v44 }
  0x43   : > { %v396_v46 = vsel %vm2747_vm1, -inf, %v394_v45 }
  0x44   : > { %v1847_v47 = vperm.slane %v396_v46, 0  ;;  %v1907_v9 = vperm.slane %v396_v46, 1 }
  0x46   : > { %v1850_v48 = vperm.slane %v1847_v47, 0  ;;  %v1912_v10 = vperm.slane %v1907_v9, 0 }
  0x48   : > { %419 = vperm.xlu2 %1715, %v1850_v48   ;;  %407 = vperm.xlu1 %1713, %v1850_v48  }
  0x49   : > { %497 = vperm.xlu0 %1727, %v1850_v48  }
  0x50   : > { %1716 = vset.pattern.permute.xlu2 %v1855_v49  ;;  %1714 = vset.pattern.permute.xlu1 %v1858_v50 }
  0x51   : > { %1728 = vset.pattern.permute.xlu0 %v1895_v6 }
  0x58   : > { %425 = vperm.xlu2 %1716, %v1850_v48   ;;  %413 = vperm.xlu1 %1714, %v1850_v48  }
  0x59   : > { %431 = vperm.xlu0 %1728, %v1850_v48  }
  0x60   : > { %1718 = vset.pattern.permute.xlu2 %v1870_v62  ;;  %1717 = vset.pattern.permute.xlu1 %v1873_v63 }
  0x61   : > { %528 = vperm.xlu0 %1728, %v1912_v10  }
  0x68   : > { %443 = vperm.xlu2 %1718, %v1850_v48   ;;  %437 = vperm.xlu1 %1717, %v1850_v48  }
  0x69   : > { %1737 = vset.pattern.permute.xlu0 %v1902_v8 }
  0x70   : > { %1720 = vset.pattern.permute.xlu2 %v1884_v4  ;;  %1719 = vset.pattern.permute.xlu1 %v1887_v5 }
  0x71   : > { %558 = vperm.xlu0 %1737, %v1912_v10  }
  0x78   : > { %455 = vperm.xlu2 %1720, %v1850_v48   ;;  %449 = vperm.xlu1 %1719, %v1850_v48  }
  0x79   : > { %1742 = vset.pattern.permute.xlu0 %v1928_v13 }
  0x80   : > { %1722 = vset.pattern.permute.xlu2 %v1899_v7  ;;  %1721 = vset.pattern.permute.xlu1 %v1902_v8 }
  0x81   : > { %588 = vperm.xlu0 %1742, %v1912_v10  }
  0x88   : > { %467 = vperm.xlu2 %1722, %v1850_v48   ;;  %461 = vperm.xlu1 %1721, %v1850_v48  }
  0x89   : > { %1746 = vset.pattern.permute.xlu0 %v1766_v51 }
  0x8e   : > { %v376_v22 = vpop.xlane.xlu0 %375 }
  0x8f   : > { %v379_v25 = vcvt.f32.s32 %v376_v22 }
  0x90   : > { %1724 = vset.pattern.permute.xlu2 %v1916_v11  ;;  %1723 = vset.pattern.permute.xlu1 %v1919_v12 }
  0x96   : > { %v378_v24 = vpop.xlane.xlu0 %377 }
  0x97   : > { %v380_v26 = vcvt.f32.s32 %v378_v24 }
  0x98   : > { %479 = vperm.xlu2 %1724, %v1850_v48   ;;  %473 = vperm.xlu1 %1723, %v1850_v48  }
  0x99   : > { %v381_v28 = vshll.u32 %v380_v26, 16 }
  0x9b   : > { %v382_v29 = vadd.s32 %v381_v28, %v379_v25 }
  0x9d   : > { %v383_v30 = vrot.slane %v382_v29, 4 }
  0x9f   : > { %v384_v32 = vadd.s32 %v383_v30, %v382_v29 }
  0xa0   : > { %1726 = vset.pattern.permute.xlu2 %v1928_v13  ;;  %1725 = vset.pattern.permute.xlu1 %v1931_v14 }
  0xa1   : > { %v385_v33 = vrot.slane %v384_v32, 2 }
  0xa2   : > { %v420_v15 = vpop.permute.xlu2 %419 }
  0xa3   : > { %599 = vst.msk [vmem:[#allocation2 + $0x10] sm:$0xff] %vm596_vm2, %v420_v15  ;;  %v386_v34 = vadd.s32 %v385_v33, %v384_v32 }
  0xa5   : > { %v387_v35 = vrot.slane %v386_v34, 1 }
  0xa7   : > { %v388_v38 = vadd.s32 %v387_v35, %v386_v34 }
  0xa8   : > { %491 = vperm.xlu2 %1726, %v1850_v48   ;;  %485 = vperm.xlu1 %1725, %v1850_v48  }
  0xa9   : > { %1698 = vpush %v388_v38 }
  0xaa   : > { %v651_v54 = vld [vmem:[#allocation2 + $0x10] sm:$0xff] }
  0xb0   : > { %1730 = vset.pattern.permute.xlu2 %v1858_v50  ;;  %1729 = vset.pattern.permute.xlu1 %v1811_v1 }
  0xb2   : > { %v426_v16 = vpop.permute.xlu2 %425 }
  0xb3   : > { %600 = vst.msk [vmem:[#allocation2 + $0x18] sm:$0xff] %vm596_vm2, %v426_v16 }
  0xb8   : > { %510 = vperm.xlu2 %1730, %v1912_v10   ;;  %504 = vperm.xlu1 %1729, %v1912_v10  }
  0xba   : > { %v408_v17 = vpop.permute.xlu1 %407  ;;  %v652_v18 = vld [vmem:[#allocation2 + $0x18] sm:$0xff] }
  0xbb   : > { %597 = vst.msk [vmem:[#allocation2] sm:$0xff] %vm596_vm2, %v408_v17  ;;  %699 = vperm.xlu0 %1746, %v652_v18   ;;  %v498_v36 = vpop.permute.xlu0 %497 }
  0xbc   : > { %612 = vst.msk [vmem:[#allocation2 + $0x78] sm:$0xff] %vm596_vm2, %v498_v36 }
  0xc0   : > { %1732 = vset.pattern.permute.xlu2 %v1855_v49  ;;  %1731 = vset.pattern.permute.xlu1 %v1817_v2 }
  0xc2   : > { %v444_v19 = vpop.permute.xlu2 %443  ;;  %v649_v48 = vld [vmem:[#allocation2] sm:$0xff] }
  0xc3   : > { %603 = vst.msk [vmem:[#allocation2 + $0x30] sm:$0xff] %vm596_vm2, %v444_v19 }
  0xc8   : > { %522 = vperm.xlu2 %1732, %v1912_v10   ;;  %516 = vperm.xlu1 %1731, %v1912_v10  }
  0xca   : > { %v414_v20 = vpop.permute.xlu1 %413  ;;  %v655_v15 = vld [vmem:[#allocation2 + $0x30] sm:$0xff] }
  0xcb   : > { %598 = vst.msk [vmem:[#allocation2 + $0x8] sm:$0xff] %vm596_vm2, %v414_v20  ;;  %v432_v43 = vpop.permute.xlu0 %431 }
  0xcc   : > { %601 = vst.msk [vmem:[#allocation2 + $0x20] sm:$0xff] %vm596_vm2, %v432_v43 }
  0xd0   : > { %1734 = vset.pattern.permute.xlu2 %v1870_v62  ;;  %1733 = vset.pattern.permute.xlu1 %v1873_v63 }
  0xd2   : > { %v456_v21 = vpop.permute.xlu2 %455  ;;  %v650_v57 = vld [vmem:[#allocation2 + $0x8] sm:$0xff] }
  0xd3   : > { %605 = vst.msk [vmem:[#allocation2 + $0x40] sm:$0xff] %vm596_vm2, %v456_v21  ;;  %v529_v46 = vpop.permute.xlu0 %528  ;;  %v653_v60 = vld [vmem:[#allocation2 + $0x20] sm:$0xff] }
  0xd4   : > { %617 = vst.msk [vmem:[#allocation2 + $0xa0] sm:$0xff] %vm596_vm2, %v529_v46 }
  0xd8   : > { %540 = vperm.xlu2 %1734, %v1912_v10   ;;  %534 = vperm.xlu1 %1733, %v1912_v10  }
  0xda   : > { %v438_v23 = vpop.permute.xlu1 %437  ;;  %s1990_s7 = spop %1698  ;;  %v657_v28 = vld [vmem:[#allocation2 + $0x40] sm:$0xff] }
  0xdb   : > { %602 = vst.msk [vmem:[#allocation2 + $0x28] sm:$0xff] %vm596_vm2, %v438_v23  ;;  %s1544_s8 = scvt.s32.f32 %s1990_s7  ;;  %v1045_v21 = vld [vmem:[#allocation2 + $0xa0] sm:$0xff]  ;;  %s390_s19 = smul.u32 3, %s1990_s7 }
  0xdd   : > { %v1545_v18 = vstv %s1544_s8 }
  0xde   : > { %1546 = vst.msk [vmem:[%s321_s11] sm:$0x1] %vm2746_vm3, %v1545_v18  ;;  %v664_v18 = vld [vmem:[#allocation2 + $0x78] sm:$0xff] }
  0xe0   : > { %1736 = vset.pattern.permute.xlu2 %v1884_v4  ;;  %1735 = vset.pattern.permute.xlu1 %v1887_v5 }
  0xe2   : > { %v468_v27 = vpop.permute.xlu2 %467  ;;  %v654_v58 = vld [vmem:[#allocation2 + $0x28] sm:$0xff] }
  0xe3   : > { %607 = vst.msk [vmem:[#allocation2 + $0x50] sm:$0xff] %vm596_vm2, %v468_v27  ;;  %v559_v53 = vpop.permute.xlu0 %558 }
  0xe4   : > { %622 = vst.msk [vmem:[#allocation2 + $0xc8] sm:$0xff] %vm596_vm2, %v559_v53 }
  0xe8   : > { %552 = vperm.xlu2 %1736, %v1912_v10   ;;  %546 = vperm.xlu1 %1735, %v1912_v10  }
  0xea   : > { %v450_v31 = vpop.permute.xlu1 %449  ;;  %v659_v27 = vld [vmem:[#allocation2 + $0x50] sm:$0xff] }
  0xeb   : > { %604 = vst.msk [vmem:[#allocation2 + $0x38] sm:$0xff] %vm596_vm2, %v450_v31  ;;  %v1050_v31 = vld [vmem:[#allocation2 + $0xc8] sm:$0xff] }
  0xf0   : > { %1739 = vset.pattern.permute.xlu2 %v1919_v12  ;;  %1738 = vset.pattern.permute.xlu1 %v1899_v7 }
  0xf2   : > { %v480_v37 = vpop.permute.xlu2 %479  ;;  %v656_v26 = vld [vmem:[#allocation2 + $0x38] sm:$0xff] }
  0xf3   : > { %609 = vst.msk [vmem:[#allocation2 + $0x60] sm:$0xff] %vm596_vm2, %v480_v37  ;;  %v589_v56 = vpop.permute.xlu0 %588 }
  0xf4   : > { %627 = vst.msk [vmem:[#allocation2 + $0xf0] sm:$0xff] %vm596_vm2, %v589_v56 }
  0xf8   : > { %570 = vperm.xlu2 %1739, %v1912_v10   ;;  %564 = vperm.xlu1 %1738, %v1912_v10  }
  0xfa   : > { %v462_v42 = vpop.permute.xlu1 %461  ;;  %v661_v43 = vld [vmem:[#allocation2 + $0x60] sm:$0xff] }
  0xfb   : > { %606 = vst.msk [vmem:[#allocation2 + $0x48] sm:$0xff] %vm596_vm2, %v462_v42 }
 0x100   : > { %1741 = vset.pattern.permute.xlu2 %v1931_v14  ;;  %1740 = vset.pattern.permute.xlu1 %v1916_v11 }
 0x102   : > { %v492_v44 = vpop.permute.xlu2 %491  ;;  %v658_v25 = vld [vmem:[#allocation2 + $0x48] sm:$0xff] }
 0x103   : > { %611 = vst.msk [vmem:[#allocation2 + $0x70] sm:$0xff] %vm596_vm2, %v492_v44  ;;  %v2007_v44 = vand.u32 127, %v403_v0 }
 0x105   : > { %vm900_vm4 = vcmp.lt.s32.totalorder %v1811_v1, %v2007_v44  ;;  %vm904_vm10 = vcmp.lt.s32.totalorder %v1817_v2, %v2007_v44 }
 0x108   : > { %582 = vperm.xlu2 %1741, %v1912_v10   ;;  %576 = vperm.xlu1 %1740, %v1912_v10  }
 0x10a   : > { %v474_v45 = vpop.permute.xlu1 %473 }
 0x10b   : > { %608 = vst.msk [vmem:[#allocation2 + $0x58] sm:$0xff] %vm596_vm2, %v474_v45 }
 0x110   : > { %1744 = vset.pattern.permute.xlu2 %v1766_v51  ;;  %1743 = vset.pattern.permute.xlu1 %v1880_v3 }
 0x111   : > { %684 = vperm.xlu2 %1744, %v649_v48  }
 0x112   : > { %v511_v52 = vpop.permute.xlu2 %510  ;;  %v660_v36 = vld [vmem:[#allocation2 + $0x58] sm:$0xff] }
 0x113   : > { %614 = vst.msk [vmem:[#allocation2 + $0x88] sm:$0xff] %vm596_vm2, %v511_v52 }
 0x118   : > { %594 = vperm.xlu1 %1743, %v1912_v10  }
 0x119   : > { %694 = vperm.xlu2 %1744, %v651_v54  }
 0x11a   : > { %v486_v55 = vpop.permute.xlu1 %485  ;;  %v1042_v61 = vld [vmem:[#allocation2 + $0x88] sm:$0xff] }
 0x11b   : > { %610 = vst.msk [vmem:[#allocation2 + $0x68] sm:$0xff] %vm596_vm2, %v486_v55 }
 0x120   : > { %1745 = vset.pattern.permute.xlu1 %v1766_v51 }
 0x121   : > { %689 = vperm.xlu1 %1745, %v650_v57   ;;  %709 = vperm.xlu2 %1744, %v654_v58  }
 0x122   : > { %v523_v59 = vpop.permute.xlu2 %522  ;;  %v662_v46 = vld [vmem:[#allocation2 + $0x68] sm:$0xff] }
 0x123   : > { %616 = vst.msk [vmem:[#allocation2 + $0x98] sm:$0xff] %vm596_vm2, %v523_v59 }
 0x129   : > { %704 = vperm.xlu1 %1745, %v653_v60   ;;  %1081 = vperm.xlu2 %1744, %v1042_v61  }
 0x12a   : > { %v505_v10 = vpop.permute.xlu1 %504  ;;  %v1044_v19 = vld [vmem:[#allocation2 + $0x98] sm:$0xff] }
 0x12b   : > { %613 = vst.msk [vmem:[#allocation2 + $0x80] sm:$0xff] %vm596_vm2, %v505_v10 }
 0x131   : > { %714 = vperm.xlu2 %1744, %v655_v15  }
 0x132   : > { %v1041_v16 = vld [vmem:[#allocation2 + $0x80] sm:$0xff]  ;;  %v541_v17 = vpop.permute.xlu2 %540 }
 0x133   : > { %1076 = vperm.xlu1 %1745, %v1041_v16   ;;  %619 = vst.msk [vmem:[#allocation2 + $0xb0] sm:$0xff] %vm596_vm2, %v541_v17  ;;  %v663_v17 = vld [vmem:[#allocation2 + $0x70] sm:$0xff] }
 0x13a   : > { %v517_v20 = vpop.permute.xlu1 %516  ;;  %v1047_v33 = vld [vmem:[#allocation2 + $0xb0] sm:$0xff] }
 0x13b   : > { %615 = vst.msk [vmem:[#allocation2 + $0x90] sm:$0xff] %vm596_vm2, %v517_v20  ;;  %1091 = vperm.xlu1 %1745, %v1044_v19   ;;  %v1055_v20 = vld [vmem:[#allocation2 + $0xf0] sm:$0xff] }
 0x142   : > { %v1043_v22 = vld [vmem:[#allocation2 + $0x90] sm:$0xff]  ;;  %v553_v23 = vpop.permute.xlu2 %552 }
 0x143   : > { %1096 = vperm.xlu1 %1745, %v1045_v21   ;;  %1086 = vperm.xlu0 %1746, %v1043_v22   ;;  %621 = vst.msk [vmem:[#allocation2 + $0xc0] sm:$0xff] %vm596_vm2, %v553_v23 }
 0x14a   : > { %v535_v24 = vpop.permute.xlu1 %534  ;;  %v1049_v38 = vld [vmem:[#allocation2 + $0xc0] sm:$0xff] }
 0x14b   : > { %618 = vst.msk [vmem:[#allocation2 + $0xa8] sm:$0xff] %vm596_vm2, %v535_v24  ;;  %729 = vperm.xlu1 %1745, %v658_v25   ;;  %719 = vperm.xlu0 %1746, %v656_v26  }
 0x152   : > { %v1046_v29 = vld [vmem:[#allocation2 + $0xa8] sm:$0xff]  ;;  %v571_v30 = vpop.permute.xlu2 %570 }
 0x153   : > { %734 = vperm.xlu1 %1745, %v659_v27   ;;  %724 = vperm.xlu0 %1746, %v657_v28   ;;  %624 = vst.msk [vmem:[#allocation2 + $0xd8] sm:$0xff] %vm596_vm2, %v571_v30  ;;  %v700_v28 = vpop.permute.xlu0 %699  ;;  %v1059_v30 = vadd.s32 128, %v1858_v50 }
 0x154   : > { %1101 = vperm.xlu2 %1744, %v1046_v29   ;;  %v2048_v29 = vadd.s32 128, %v2007_v44 }
 0x15a   : > { %v547_v32 = vpop.permute.xlu1 %546  ;;  %v1052_v45 = vld [vmem:[#allocation2 + $0xd8] sm:$0xff] }
 0x15b   : > { %620 = vst.msk [vmem:[#allocation2 + $0xb8] sm:$0xff] %vm596_vm2, %v547_v32  ;;  %1121 = vperm.xlu1 %1745, %v1050_v31  }
 0x15c   : > { %1106 = vperm.xlu2 %1744, %v1047_v33  }
 0x162   : > { %v583_v34 = vpop.permute.xlu2 %582  ;;  %v1048_v35 = vld [vmem:[#allocation2 + $0xb8] sm:$0xff] }
 0x163   : > { %626 = vst.msk [vmem:[#allocation2 + $0xe8] sm:$0xff] %vm596_vm2, %v583_v34  ;;  %1111 = vperm.xlu0 %1746, %v1048_v35  }
 0x164   : > { %739 = vperm.xlu2 %1744, %v660_v36  }
 0x16a   : > { %v565_v37 = vpop.permute.xlu1 %564  ;;  %v1054_v19 = vld [vmem:[#allocation2 + $0xe8] sm:$0xff] }
 0x16b   : > { %623 = vst.msk [vmem:[#allocation2 + $0xd0] sm:$0xff] %vm596_vm2, %v565_v37  ;;  %v685_v42 = vpop.permute.xlu2 %684  ;;  %1116 = vperm.xlu0 %1746, %v1049_v38   ;;  %v2080_v37 = vadd.s32 128, %v1811_v1 }
 0x16c   : > { %744 = vperm.xlu2 %1744, %v661_v43   ;;  %vm868_vm5 = vcmp.eq.f32.partialorder %v685_v42, %v1847_v47  ;;  %vm762_vm6 = vcmp.gt.f32.partialorder %v685_v42, %v1847_v47  ;;  %vm763_vm7 = vcmp.gt.f32.partialorder %v685_v42, %v1907_v9  ;;  %vm869_vm8 = vcmp.eq.f32.partialorder %v685_v42, %v1907_v9 }
 0x16d   : > { %vm932_vm9 = vmand %vm868_vm5, %vm900_vm4  ;;  %v794_v0 = vsel %vm762_vm6, 1, %v1766_v51  ;;  %v795_v52 = vsel %vm763_vm7, 1, %v1766_v51  ;;  %v965_v53 = vsel %vm869_vm8, 1, %v1766_v51  ;;  %vm906_vm4 = vcmp.lt.s32.totalorder %v1855_v49, %v2007_v44 }
 0x16e   : > { %v964_v55 = vsel %vm932_vm9, 1, %v1766_v51  ;;  %vm874_vm5 = vcmp.eq.f32.partialorder %v700_v28, %v1847_v47  ;;  %vm769_vm6 = vcmp.gt.f32.partialorder %v700_v28, %v1907_v9  ;;  %vm875_vm7 = vcmp.eq.f32.partialorder %v700_v28, %v1907_v9 }
 0x16f   : > { %vm910_vm8 = vcmp.lt.s32.totalorder %v1873_v63, %v2007_v44  ;;  %v801_v34 = vsel %vm769_vm6, 1, %v1766_v51  ;;  %v971_v35 = vsel %vm875_vm7, 1, %v1766_v51 }
 0x172   : > { %v1051_v48 = vld [vmem:[#allocation2 + $0xd0] sm:$0xff] }
 0x173   : > { %v695_v54 = vpop.permute.xlu2 %694  ;;  %749 = vperm.xlu0 %1746, %v662_v46   ;;  %1126 = vperm.xlu1 %1745, %v1051_v48   ;;  %v2092_v48 = vadd.s32 128, %v1873_v63 }
 0x174   : > { %vm766_vm11 = vcmp.gt.f32.partialorder %v695_v54, %v1847_v47  ;;  %vm767_vm12 = vcmp.gt.f32.partialorder %v695_v54, %v1907_v9  ;;  %vm872_vm13 = vcmp.eq.f32.partialorder %v695_v54, %v1847_v47  ;;  %vm873_vm14 = vcmp.eq.f32.partialorder %v695_v54, %v1907_v9  ;;  %1131 = vperm.xlu2 %1744, %v1052_v45  }
 0x175   : > { %v798_v56 = vsel %vm766_vm11, 1, %v1766_v51  ;;  %v799_v57 = vsel %vm767_vm12, 1, %v1766_v51  ;;  %vm936_vm15 = vmand %vm872_vm13, %vm904_vm10  ;;  %v969_v58 = vsel %vm873_vm14, 1, %v1766_v51  ;;  %vm1295_vm11 = vcmp.lt.s32.totalorder %v1059_v30, %v2048_v29 }
 0x176   : > { %v2031_v59 = vadd.s32 %v798_v56, %v794_v0  ;;  %v2033_v60 = vadd.s32 %v799_v57, %v795_v52  ;;  %v968_v61 = vsel %vm936_vm15, 1, %v1766_v51  ;;  %v2036_v10 = vadd.s32 %v969_v58, %v965_v53  ;;  %vm938_vm10 = vmand %vm874_vm5, %vm906_vm4 }
 0x177   : > { %v2038_v15 = vadd.s32 %v968_v61, %v964_v55  ;;  %v970_v36 = vsel %vm938_vm10, 1, %v1766_v51  ;;  %vm912_vm4 = vcmp.lt.s32.totalorder %v1870_v62, %v2007_v44  ;;  %vm902_vm5 = vcmp.lt.s32.totalorder %v1858_v50, %v2007_v44 }
 0x178   : > { %v1061_v58 = vadd.s32 128, %v1855_v49 }
 0x17a   : > { %v577_v16 = vpop.permute.xlu1 %576 }
 0x17b   : > { %625 = vst.msk [vmem:[#allocation2 + $0xe0] sm:$0xff] %vm596_vm2, %v577_v16  ;;  %754 = vperm.xlu0 %1746, %v663_v17   ;;  %759 = vperm.xlu1 %1745, %v664_v18   ;;  %v710_v23 = vpop.permute.xlu2 %709  ;;  %v1060_v17 = vadd.s32 128, %v1817_v2  ;;  %v2160_v2 = vadd.s32 128, %v1870_v62 }
 0x17c   : > { %vm878_vm9 = vcmp.eq.f32.partialorder %v710_v23, %v1847_v47  ;;  %vm772_vm13 = vcmp.gt.f32.partialorder %v710_v23, %v1847_v47  ;;  %vm773_vm14 = vcmp.gt.f32.partialorder %v710_v23, %v1907_v9  ;;  %vm879_vm15 = vcmp.eq.f32.partialorder %v710_v23, %v1907_v9 }
 0x17d   : > { %vm942_vm3 = vmand %vm878_vm9, %vm910_vm8  ;;  %v804_v38 = vsel %vm772_vm13, 1, %v1766_v51  ;;  %v805_v42 = vsel %vm773_vm14, 1, %v1766_v51  ;;  %v975_v45 = vsel %vm879_vm15, 1, %v1766_v51  ;;  %vm1293_vm15 = vcmp.lt.s32.totalorder %v2080_v37, %v2048_v29 }
 0x17e   : > { %v974_v43 = vsel %vm942_vm3, 1, %v1766_v51 }
 0x182   : > { %v1053_v21 = vld [vmem:[#allocation2 + $0xe0] sm:$0xff] }
 0x183   : > { %1141 = vperm.xlu0 %1746, %v1054_v19   ;;  %1146 = vperm.xlu1 %1745, %v1055_v20   ;;  %v1082_v26 = vpop.permute.xlu2 %1081 }
 0x184   : > { %1136 = vperm.xlu2 %1744, %v1053_v21   ;;  %vm1263_vm12 = vcmp.eq.f32.partialorder %v1082_v26, %v1907_v9  ;;  %vm1156_vm6 = vcmp.gt.f32.partialorder %v1082_v26, %v1847_v47  ;;  %vm1157_vm7 = vcmp.gt.f32.partialorder %v1082_v26, %v1907_v9 }
 0x185   : > { %vm1327_vm1 = vmand %vm1263_vm12, %vm1295_vm11  ;;  %v2097_v52 = vsel %vm1156_vm6, 1, %v1766_v51  ;;  %v2100_v53 = vsel %vm1157_vm7, 1, %v1766_v51 }
 0x186   : > { %v2103_v54 = vsel %vm1327_vm1, 1, %v1766_v51 }
 0x18a   : > { %v595_v22 = vpop.permute.xlu1 %594 }
 0x18b   : > { %628 = vst.msk [vmem:[#allocation2 + $0xf8] sm:$0xff] %vm596_vm2, %v595_v22  ;;  %vm768_vm2 = vcmp.gt.f32.partialorder %v700_v28, %v1847_v47  ;;  %v2055_v32 = vpop.permute.xlu2 %714 }
 0x18c   : > { %v800_v33 = vsel %vm768_vm2, 1, %v1766_v51  ;;  %vm908_vm2 = vcmp.lt.s32.totalorder %v1895_v6, %v2007_v44  ;;  %vm774_vm3 = vcmp.gt.f32.partialorder %v2055_v32, %v1847_v47  ;;  %vm775_vm12 = vcmp.gt.f32.partialorder %v2055_v32, %v1907_v9 }
 0x18d   : > { %vm880_vm6 = vcmp.eq.f32.partialorder %v2055_v32, %v1847_v47  ;;  %v806_v56 = vsel %vm774_vm3, 1, %v1766_v51  ;;  %v807_v18 = vsel %vm775_vm12, 1, %v1766_v51 }
 0x192   : > { %v1056_v24 = vld [vmem:[#allocation2 + $0xf8] sm:$0xff] }
 0x193   : > { %1151 = vperm.xlu2 %1744, %v1056_v24   ;;  %v690_v25 = vpop.permute.xlu1 %689  ;;  %v2163_v24 = vadd.s32 128, %v1895_v6 }
 0x194   : > { %vm870_vm0 = vcmp.eq.f32.partialorder %v690_v25, %v1847_v47  ;;  %vm764_vm8 = vcmp.gt.f32.partialorder %v690_v25, %v1847_v47  ;;  %vm765_vm9 = vcmp.gt.f32.partialorder %v690_v25, %v1907_v9  ;;  %vm871_vm10 = vcmp.eq.f32.partialorder %v690_v25, %v1907_v9 }
 0x195   : > { %vm934_vm11 = vmand %vm870_vm0, %vm902_vm5  ;;  %v796_v50 = vsel %vm764_vm8, 1, %v1766_v51  ;;  %v797_v63 = vsel %vm765_vm9, 1, %v1766_v51  ;;  %v967_v55 = vsel %vm871_vm10, 1, %v1766_v51  ;;  %vm881_vm0 = vcmp.eq.f32.partialorder %v2055_v32, %v1907_v9 }
 0x196   : > { %v966_v57 = vsel %vm934_vm11, 1, %v1766_v51  ;;  %vm1303_vm5 = vcmp.lt.s32.totalorder %v2092_v48, %v2048_v29  ;;  %vm944_vm9 = vmand %vm880_vm6, %vm912_vm4  ;;  %v827_v49 = vadd.s32 %v800_v33, %v796_v50  ;;  %v848_v19 = vadd.s32 %v801_v34, %v797_v63 }
 0x197   : > { %v1018_v20 = vadd.s32 %v971_v35, %v967_v55  ;;  %v977_v21 = vsel %vm881_vm0, 1, %v1766_v51  ;;  %v997_v22 = vadd.s32 %v970_v36, %v966_v57  ;;  %v976_v33 = vsel %vm944_vm9, 1, %v1766_v51 }
 0x198   : > { %vm1299_vm4 = vcmp.lt.s32.totalorder %v1061_v58, %v2048_v29  ;;  %vm1297_vm10 = vcmp.lt.s32.totalorder %v1060_v17, %v2048_v29  ;;  %v2183_v6 = vadd.s32 %v827_v49, %v804_v38  ;;  %v2279_v49 = vadd.s32 128, %v1919_v12 }
 0x199   : > { %v2195_v35 = vadd.s32 %v997_v22, %v974_v43 }
 0x19b   : > { %v2042_v27 = vpop.permute.xlu1 %704 }
 0x19c   : > { %vm770_vm13 = vcmp.gt.f32.partialorder %v2042_v27, %v1847_v47  ;;  %vm771_vm14 = vcmp.gt.f32.partialorder %v2042_v27, %v1907_v9  ;;  %vm876_vm1 = vcmp.eq.f32.partialorder %v2042_v27, %v1847_v47  ;;  %vm877_vm7 = vcmp.eq.f32.partialorder %v2042_v27, %v1907_v9 }
 0x19d   : > { %v802_v61 = vsel %vm770_vm13, 1, %v1766_v51  ;;  %v803_v16 = vsel %vm771_vm14, 1, %v1766_v51  ;;  %vm940_vm8 = vmand %vm876_vm1, %vm908_vm2  ;;  %v973_v30 = vsel %vm877_vm7, 1, %v1766_v51 }
 0x19e   : > { %v828_v25 = vadd.s32 %v2031_v59, %v802_v61  ;;  %v849_v26 = vadd.s32 %v2033_v60, %v803_v16  ;;  %v972_v28 = vsel %vm940_vm8, 1, %v1766_v51  ;;  %v2185_v59 = vadd.s32 %v848_v19, %v805_v42 }
 0x19f   : > { %v2187_v60 = vadd.s32 %v1018_v20, %v975_v45  ;;  %v998_v27 = vadd.s32 %v2038_v15, %v972_v28  ;;  %v1019_v34 = vadd.s32 %v2036_v10, %v973_v30 }
 0x1a0   : > { %v2209_v10 = vadd.s32 %v828_v25, %v806_v56  ;;  %v2211_v36 = vadd.s32 %v849_v26, %v807_v18 }
 0x1a1   : > { %v2253_v43 = vadd.s32 %v998_v27, %v976_v33  ;;  %v2255_v45 = vadd.s32 %v1019_v34, %v977_v21 }
 0x1a5   : > { %v2051_v31 = vpop.permute.xlu1 %1076 }
 0x1a6   : > { %vm1261_vm3 = vcmp.eq.f32.partialorder %v2051_v31, %v1907_v9  ;;  %vm1154_vm0 = vcmp.gt.f32.partialorder %v2051_v31, %v1847_v47  ;;  %vm1155_vm7 = vcmp.gt.f32.partialorder %v2051_v31, %v1907_v9  ;;  %v2349_v31 = vadd.s32 128, %v1884_v4 }
 0x1a7   : > { %vm1325_vm8 = vmand %vm1261_vm3, %vm1293_vm15  ;;  %v1186_v48 = vsel %vm1154_vm0, 1, %v1766_v51  ;;  %vm916_vm0 = vcmp.lt.s32.totalorder %v1884_v4, %v2007_v44 }
 0x1a8   : > { %v1357_v50 = vsel %vm1325_vm8, 1, %v1766_v51 }
 0x1ad   : > { %v2086_v46 = vpop.permute.xlu1 %1091 }
 0x1ae   : > { %v2094_v0 = vpop.permute.xlu2 %1101  ;;  %vm1267_vm2 = vcmp.eq.f32.partialorder %v2086_v46, %v1907_v9  ;;  %vm1160_vm11 = vcmp.gt.f32.partialorder %v2086_v46, %v1847_v47  ;;  %vm1161_vm14 = vcmp.gt.f32.partialorder %v2086_v46, %v1907_v9 }
 0x1af   : > { %vm1271_vm13 = vcmp.eq.f32.partialorder %v2094_v0, %v1907_v9  ;;  %vm2203_vm1 = vmand %vm1267_vm2, %vm1299_vm4  ;;  %vm914_vm2 = vcmp.lt.s32.totalorder %v1887_v5, %v2007_v44  ;;  %vm1164_vm6 = vcmp.gt.f32.partialorder %v2094_v0, %v1847_v47  ;;  %vm1165_vm12 = vcmp.gt.f32.partialorder %v2094_v0, %v1907_v9 }
 0x1b0   : > { %v1192_v37 = vsel %vm1160_vm11, 1, %v1766_v51  ;;  %vm2242_vm3 = vmand %vm1271_vm13, %vm1303_vm5  ;;  %v1193_v38 = vsel %vm1161_vm14, 1, %v1766_v51  ;;  %v1363_v42 = vsel %vm2203_vm1, 1, %v1766_v51  ;;  %v1187_v0 = vsel %vm1155_vm7, 1, %v1766_v51 }
 0x1b1   : > { %v1196_v55 = vsel %vm1164_vm6, 1, %v1766_v51  ;;  %v1197_v56 = vsel %vm1165_vm12, 1, %v1766_v51  ;;  %v1219_v57 = vadd.s32 %v1192_v37, %v2097_v52  ;;  %vm922_vm11 = vcmp.lt.s32.totalorder %v1919_v12, %v2007_v44 }
 0x1b2   : > { %v1367_v61 = vsel %vm2242_vm3, 1, %v1766_v51  ;;  %v1240_v16 = vadd.s32 %v1193_v38, %v2100_v53  ;;  %v1410_v17 = vadd.s32 %v1363_v42, %v2103_v54  ;;  %v2293_v53 = vadd.s32 128, %v1902_v8 }
 0x1b3   : > { %v2301_v54 = vadd.s32 128, %v1887_v5  ;;  %v2303_v22 = vadd.s32 %v1219_v57, %v1196_v55  ;;  %vm2753_vm7 = vcmp.lt.s32.totalorder %v2163_v24, %v2048_v29 }
 0x1b4   : > { %v2325_v28 = vadd.s32 %v1240_v16, %v1197_v56 }
 0x1b5   : > { %v1087_v23 = vpop.permute.xlu0 %1086  ;;  %v2179_v62 = vpop.permute.xlu1 %1096 }
 0x1b6   : > { %v2172_v32 = vpop.permute.xlu2 %1106  ;;  %vm1158_vm9 = vcmp.gt.f32.partialorder %v1087_v23, %v1847_v47  ;;  %vm1265_vm4 = vcmp.eq.f32.partialorder %v1087_v23, %v1907_v9  ;;  %vm1159_vm15 = vcmp.gt.f32.partialorder %v1087_v23, %v1907_v9  ;;  %vm1269_vm12 = vcmp.eq.f32.partialorder %v2179_v62, %v1907_v9 }
 0x1b7   : > { %v1190_v63 = vsel %vm1158_vm9, 1, %v1766_v51  ;;  %vm1329_vm5 = vmand %vm1265_vm4, %vm1297_vm10  ;;  %v1191_v58 = vsel %vm1159_vm15, 1, %v1766_v51  ;;  %vm1162_vm10 = vcmp.gt.f32.partialorder %v2179_v62, %v1847_v47  ;;  %vm1273_vm13 = vcmp.eq.f32.partialorder %v2172_v32, %v1907_v9 }
 0x1b8   : > { %v1218_v19 = vadd.s32 %v1190_v63, %v1186_v48  ;;  %v1361_v52 = vsel %vm1329_vm5, 1, %v1766_v51  ;;  %v1239_v21 = vadd.s32 %v1191_v58, %v1187_v0  ;;  %vm1163_vm14 = vcmp.gt.f32.partialorder %v2179_v62, %v1907_v9  ;;  %vm1333_vm8 = vmand %vm1269_vm12, %vm2753_vm7 }
 0x1b9   : > { %vm1166_vm1 = vcmp.gt.f32.partialorder %v2172_v32, %v1847_v47  ;;  %v1409_v23 = vadd.s32 %v1361_v52, %v1357_v50  ;;  %v1194_v25 = vsel %vm1162_vm10, 1, %v1766_v51  ;;  %vm918_vm15 = vcmp.lt.s32.totalorder %v1902_v8, %v2007_v44 }
 0x1ba   : > { %vm1167_vm3 = vcmp.gt.f32.partialorder %v2172_v32, %v1907_v9  ;;  %vm2754_vm5 = vcmp.lt.s32.totalorder %v2160_v2, %v2048_v29  ;;  %v1195_v24 = vsel %vm1163_vm14, 1, %v1766_v51  ;;  %v1220_v26 = vadd.s32 %v1218_v19, %v1194_v25 }
 0x1bb   : > { %vm1337_vm10 = vmand %vm1273_vm13, %vm2754_vm5  ;;  %v1198_v30 = vsel %vm1166_vm1, 1, %v1766_v51  ;;  %v1241_v33 = vadd.s32 %v1239_v21, %v1195_v24  ;;  %v2337_v2 = vadd.s32 %v1410_v17, %v1367_v61  ;;  %v1365_v62 = vsel %vm1333_vm8, 1, %v1766_v51 }
 0x1bc   : > { %vm924_vm1 = vcmp.lt.s32.totalorder %v1916_v11, %v2007_v44  ;;  %v1199_v32 = vsel %vm1167_vm3, 1, %v1766_v51  ;;  %v1369_v5 = vsel %vm1337_vm10, 1, %v1766_v51  ;;  %v1411_v15 = vadd.s32 %v1409_v23, %v1365_v62 }
 0x1bd   : > { %v720_v46 = vpop.permute.xlu0 %719  ;;  %v2286_v20 = vpop.permute.xlu1 %729  ;;  %v2357_v48 = vadd.s32 %v1220_v26, %v1198_v30  ;;  %vm1307_vm10 = vcmp.lt.s32.totalorder %v2301_v54, %v2048_v29  ;;  %v2430_v19 = vadd.s32 128, %v1916_v11 }
 0x1be   : > { %v2276_v18 = vpop.permute.xlu2 %739  ;;  %vm882_vm6 = vcmp.eq.f32.partialorder %v720_v46, %v1847_v47  ;;  %vm776_vm9 = vcmp.gt.f32.partialorder %v720_v46, %v1847_v47  ;;  %vm777_vm4 = vcmp.gt.f32.partialorder %v720_v46, %v1907_v9  ;;  %vm883_vm12 = vcmp.eq.f32.partialorder %v720_v46, %v1907_v9 }
 0x1bf   : > { %vm946_vm13 = vmand %vm882_vm6, %vm914_vm2  ;;  %v808_v27 = vsel %vm776_vm9, 1, %v1766_v51  ;;  %v809_v34 = vsel %vm777_vm4, 1, %v1766_v51  ;;  %vm890_vm14 = vcmp.eq.f32.partialorder %v2276_v18, %v1847_v47  ;;  %v979_v42 = vsel %vm883_vm12, 1, %v1766_v51 }
 0x1c0   : > { %v978_v38 = vsel %vm946_vm13, 1, %v1766_v51  ;;  %vm784_vm2 = vcmp.gt.f32.partialorder %v2276_v18, %v1847_v47  ;;  %vm920_vm6 = vcmp.lt.s32.totalorder %v1899_v7, %v2007_v44  ;;  %v831_v0 = vadd.s32 %v2183_v6, %v808_v27  ;;  %vm954_vm8 = vmand %vm890_vm14, %vm922_vm11 }
 0x1c1   : > { %v852_v50 = vadd.s32 %v2185_v59, %v809_v34  ;;  %vm785_vm7 = vcmp.gt.f32.partialorder %v2276_v18, %v1907_v9  ;;  %v2369_v46 = vadd.s32 %v1241_v33, %v1199_v32  ;;  %vm891_vm9 = vcmp.eq.f32.partialorder %v2276_v18, %v1907_v9 }
 0x1c2   : > { %vm780_vm4 = vcmp.gt.f32.partialorder %v2286_v20, %v1847_v47  ;;  %vm781_vm3 = vcmp.gt.f32.partialorder %v2286_v20, %v1907_v9  ;;  %v1001_v12 = vadd.s32 %v2195_v35, %v978_v38  ;;  %v1022_v59 = vadd.s32 %v2187_v60, %v979_v42 }
 0x1c3   : > { %v2386_v55 = vsel %vm784_vm2, 1, %v1766_v51  ;;  %vm886_vm11 = vcmp.eq.f32.partialorder %v2286_v20, %v1847_v47  ;;  %v2393_v56 = vsel %vm785_vm7, 1, %v1766_v51  ;;  %v2396_v57 = vsel %vm954_vm8, 1, %v1766_v51 }
 0x1c4   : > { %vm887_vm12 = vcmp.eq.f32.partialorder %v2286_v20, %v1907_v9  ;;  %v2402_v60 = vsel %vm891_vm9, 1, %v1766_v51  ;;  %v812_v35 = vsel %vm780_vm4, 1, %v1766_v51  ;;  %v813_v58 = vsel %vm781_vm3, 1, %v1766_v51  ;;  %vm950_vm7 = vmand %vm886_vm11, %vm918_vm15 }
 0x1c5   : > { %v725_v37 = vpop.permute.xlu0 %724  ;;  %v2378_v6 = vpop.permute.xlu1 %734  ;;  %v2412_v61 = vadd.s32 %v831_v0, %v812_v35  ;;  %v2414_v16 = vadd.s32 %v852_v50, %v813_v58  ;;  %vm1315_vm4 = vcmp.lt.s32.totalorder %v2279_v49, %v2048_v29  ;;  %v983_v4 = vsel %vm887_vm12, 1, %v1766_v51 }
 0x1c6   : > { %v745_v63 = vpop.permute.xlu2 %744  ;;  %vm884_vm5 = vcmp.eq.f32.partialorder %v725_v37, %v1847_v47  ;;  %vm778_vm13 = vcmp.gt.f32.partialorder %v725_v37, %v1847_v47  ;;  %vm779_vm14 = vcmp.gt.f32.partialorder %v725_v37, %v1907_v9  ;;  %vm885_vm8 = vcmp.eq.f32.partialorder %v725_v37, %v1907_v9 }
 0x1c7   : > { %vm948_vm2 = vmand %vm884_vm5, %vm916_vm0  ;;  %vm892_vm9 = vcmp.eq.f32.partialorder %v745_v63, %v1847_v47  ;;  %v810_v17 = vsel %vm778_vm13, 1, %v1766_v51  ;;  %vm1311_vm0 = vcmp.lt.s32.totalorder %v2293_v53, %v2048_v29  ;;  %v2427_v18 = vadd.s32 %v1411_v15, %v1369_v5 }
 0x1c8   : > { %v811_v8 = vsel %vm779_vm14, 1, %v1766_v51  ;;  %v980_v52 = vsel %vm948_vm2, 1, %v1766_v51  ;;  %vm786_vm15 = vcmp.gt.f32.partialorder %v745_v63, %v1847_v47  ;;  %vm888_vm3 = vcmp.eq.f32.partialorder %v2378_v6, %v1847_v47  ;;  %vm956_vm12 = vmand %vm892_vm9, %vm924_vm1 }
 0x1c9   : > { %v982_v20 = vsel %vm950_vm7, 1, %v1766_v51  ;;  %v981_v21 = vsel %vm885_vm8, 1, %v1766_v51  ;;  %vm787_vm5 = vcmp.gt.f32.partialorder %v745_v63, %v1907_v9  ;;  %vm893_vm11 = vcmp.eq.f32.partialorder %v745_v63, %v1907_v9  ;;  %vm952_vm1 = vmand %vm888_vm3, %vm920_vm6 }
 0x1ca   : > { %v2446_v23 = vadd.s32 %v1001_v12, %v982_v20  ;;  %v2448_v25 = vadd.s32 %v1022_v59, %v983_v4  ;;  %v832_v24 = vadd.s32 %v2209_v10, %v810_v17  ;;  %vm782_vm13 = vcmp.gt.f32.partialorder %v2378_v6, %v1847_v47 }
 0x1cb   : > { %v853_v26 = vadd.s32 %v2211_v36, %v811_v8  ;;  %v1002_v30 = vadd.s32 %v2253_v43, %v980_v52  ;;  %v2456_v33 = vsel %vm786_vm15, 1, %v1766_v51  ;;  %vm783_vm14 = vcmp.gt.f32.partialorder %v2378_v6, %v1907_v9  ;;  %v1486_v8 = vld [vmem:[%s303_s15] sm:$0x77] }
 0x1cc   : > { %v1023_v10 = vadd.s32 %v2255_v45, %v981_v21  ;;  %v2465_v62 = vsel %vm787_vm5, 1, %v1766_v51  ;;  %v2468_v36 = vsel %vm956_vm12, 1, %v1766_v51  ;;  %v2471_v43 = vsel %vm893_vm11, 1, %v1766_v51  ;;  %v1487_v52 = vld [vmem:[%s308_s18] sm:$0x77] }
 0x1cd   : > { %v1122_v27 = vpop.permute.xlu1 %1121  ;;  %v814_v32 = vsel %vm782_vm13, 1, %v1766_v51  ;;  %vm1309_vm8 = vcmp.lt.s32.totalorder %v2349_v31, %v2048_v29  ;;  %v815_v45 = vsel %vm783_vm14, 1, %v1766_v51  ;;  %vm889_vm9 = vcmp.eq.f32.partialorder %v2378_v6, %v1907_v9 }
 0x1ce   : > { %v1132_v11 = vpop.permute.xlu2 %1131  ;;  %v984_v5 = vsel %vm952_vm1, 1, %v1766_v51  ;;  %vm1279_vm5 = vcmp.eq.f32.partialorder %v1122_v27, %v1907_v9  ;;  %vm1172_vm13 = vcmp.gt.f32.partialorder %v1122_v27, %v1847_v47  ;;  %vm1173_vm14 = vcmp.gt.f32.partialorder %v1122_v27, %v1907_v9 }
 0x1cf   : > { %vm1283_vm15 = vcmp.eq.f32.partialorder %v1132_v11, %v1907_v9  ;;  %vm1176_vm11 = vcmp.gt.f32.partialorder %v1132_v11, %v1847_v47  ;;  %vm1177_vm12 = vcmp.gt.f32.partialorder %v1132_v11, %v1907_v9  ;;  %v834_v42 = vadd.s32 %v832_v24, %v814_v32  ;;  %vm2513_vm1 = vmand %vm1279_vm5, %vm1311_vm0 }
 0x1d0   : > { %v855_v54 = vadd.s32 %v853_v26, %v815_v45  ;;  %v985_v0 = vsel %vm889_vm9, 1, %v1766_v51  ;;  %v1004_v50 = vadd.s32 %v1002_v30, %v984_v5  ;;  %v1208_v35 = vsel %vm1176_vm11, 1, %v1766_v51 }
 0x1d1   : > { %v1025_v63 = vadd.s32 %v1023_v10, %v985_v0  ;;  %v1209_v53 = vsel %vm1177_vm12, 1, %v1766_v51  ;;  %v1204_v58 = vsel %vm1172_vm13, 1, %v1766_v51  ;;  %vm1317_vm0 = vcmp.lt.s32.totalorder %v2430_v19, %v2048_v29 }
 0x1d2   : > { %v2539_v4 = vadd.s32 %v2412_v61, %v2386_v55  ;;  %v1068_v17 = vadd.s32 128, %v1899_v7  ;;  %v1375_v20 = vsel %vm2513_vm1, 1, %v1766_v51  ;;  %v1488_v21 = vsub.f32 %v1486_v8, %v1487_v52 }
 0x1d3   : > { %v856_v55 = vadd.s32 %v2414_v16, %v2393_v56  ;;  %v1005_v7 = vadd.s32 %v2446_v23, %v2396_v57  ;;  %v1026_v61 = vadd.s32 %v2448_v25, %v2402_v60  ;;  %v2555_v11 = vadd.s32 %v834_v42, %v2456_v33 }
 0x1d4   : > { %v2563_v56 = vadd.s32 %v855_v54, %v2465_v62  ;;  %v1489_v16 = vand.u32 2147483647, %v1488_v21  ;;  %v2567_v60 = vadd.s32 %v1004_v50, %v2468_v36  ;;  %v2570_v23 = vadd.s32 %v1025_v63, %v2471_v43 }
 0x1d5   : > { %v1112_v34 = vpop.permute.xlu0 %1111  ;;  %v1491_v25 = vmul.f32 0.5, %v1488_v21  ;;  %v2573_v33 = vadd.s32 128, %v1880_v3  ;;  %vm928_vm5 = vcmp.lt.s32.totalorder %v1928_v13, %v2007_v44 }
 0x1d6   : > { %vm1168_vm2 = vcmp.gt.f32.partialorder %v1112_v34, %v1847_v47  ;;  %vm1169_vm6 = vcmp.gt.f32.partialorder %v1112_v34, %v1907_v9  ;;  %vm1275_vm7 = vcmp.eq.f32.partialorder %v1112_v34, %v1907_v9 }
 0x1d7   : > { %vm1339_vm3 = vmand %vm1275_vm7, %vm1307_vm10  ;;  %v1200_v15 = vsel %vm1168_vm2, 1, %v1766_v51  ;;  %v1201_v37 = vsel %vm1169_vm6, 1, %v1766_v51 }
 0x1d8   : > { %v1371_v38 = vsel %vm1339_vm3, 1, %v1766_v51  ;;  %vm1347_vm10 = vmand %vm1283_vm15, %vm1315_vm4  ;;  %v1223_v49 = vadd.s32 %v2303_v22, %v1200_v15  ;;  %v1244_v12 = vadd.s32 %v2325_v28, %v1201_v37  ;;  %v1205_v22 = vsel %vm1173_vm14, 1, %v1766_v51 }
 0x1d9   : > { %v1414_v59 = vadd.s32 %v2337_v2, %v1371_v38  ;;  %vm926_vm4 = vcmp.lt.s32.totalorder %v1931_v14, %v2007_v44  ;;  %v1379_v28 = vsel %vm1347_vm10, 1, %v1766_v51  ;;  %vm1313_vm15 = vcmp.lt.s32.totalorder %v1068_v17, %v2048_v29 }
 0x1da   : > { %v1225_v24 = vadd.s32 %v1223_v49, %v1204_v58  ;;  %v1246_v26 = vadd.s32 %v1244_v12, %v1205_v22  ;;  %v1492_v15 = vmul.f32 %v1491_v25, %v1488_v21  ;;  %v1692_v37 = vadd.f32 -0.5, %v1489_v16 }
 0x1db   : > { %v1416_v30 = vadd.s32 %v1414_v59, %v1375_v20  ;;  %v2626_v49 = vadd.s32 128, %v1931_v14  ;;  %v2633_v58 = vadd.s32 128, %v1928_v13 }
 0x1dc   : > { %v2575_v31 = vadd.s32 %v1225_v24, %v1208_v35  ;;  %v2577_v34 = vadd.s32 %v1246_v26, %v1209_v53 }
 0x1dd   : > { %v1117_v2 = vpop.permute.xlu0 %1116  ;;  %v2579_v32 = vadd.s32 %v1416_v30, %v1379_v28 }
 0x1de   : > { %vm1170_vm2 = vcmp.gt.f32.partialorder %v1117_v2, %v1847_v47  ;;  %vm1277_vm6 = vcmp.eq.f32.partialorder %v1117_v2, %v1907_v9  ;;  %vm1171_vm7 = vcmp.gt.f32.partialorder %v1117_v2, %v1907_v9  ;;  %v1137_v27 = vpop.permute.xlu2 %1136 }
 0x1df   : > { %v1202_v10 = vsel %vm1170_vm2, 1, %v1766_v51  ;;  %vm1341_vm9 = vmand %vm1277_vm6, %vm1309_vm8  ;;  %v1203_v57 = vsel %vm1171_vm7, 1, %v1766_v51  ;;  %vm1178_vm8 = vcmp.gt.f32.partialorder %v1137_v27, %v1847_v47  ;;  %vm1179_vm3 = vcmp.gt.f32.partialorder %v1137_v27, %v1907_v9 }
 0x1e0   : > { %v1224_v62 = vadd.s32 %v2357_v48, %v1202_v10  ;;  %v1373_v45 = vsel %vm1341_vm9, 1, %v1766_v51  ;;  %v1245_v36 = vadd.s32 %v2369_v46, %v1203_v57  ;;  %vm1285_vm11 = vcmp.eq.f32.partialorder %v1137_v27, %v1907_v9 }
 0x1e1   : > { %v1415_v48 = vadd.s32 %v2427_v18, %v1373_v45  ;;  %v1210_v38 = vsel %vm1178_vm8, 1, %v1766_v51  ;;  %vm1323_vm6 = vcmp.lt.s32.totalorder %v2573_v33, %v2048_v29  ;;  %vm2601_vm7 = vcmp.lt.f32.partialorder %v1489_v16, 1.0  ;;  %vm1349_vm9 = vmand %vm1285_vm11, %vm1317_vm0 }
 0x1e2   : > { %v1211_v42 = vsel %vm1179_vm3, 1, %v1766_v51  ;;  %v1494_v12 = vsel %vm2601_vm7, %v1492_v15, %v1692_v37  ;;  %v1381_v59 = vsel %vm1349_vm9, 1, %v1766_v51 }
 0x1e3   : > { %1496 = vst [vmem:[#allocation1] ss:$2 sm:$0xff] %v1494_v12 }
 0x1e5   : > { %v750_v43 = vpop.permute.xlu0 %749  ;;  %v1127_v5 = vpop.permute.xlu1 %1126 }
 0x1e6   : > { %vm788_vm12 = vcmp.gt.f32.partialorder %v750_v43, %v1847_v47  ;;  %vm789_vm13 = vcmp.gt.f32.partialorder %v750_v43, %v1907_v9  ;;  %vm894_vm14 = vcmp.eq.f32.partialorder %v750_v43, %v1847_v47  ;;  %vm895_vm10 = vcmp.eq.f32.partialorder %v750_v43, %v1907_v9 }
 0x1e7   : > { %vm958_vm1 = vmand %vm894_vm14, %vm926_vm4  ;;  %vm1174_vm2 = vcmp.gt.f32.partialorder %v1127_v5, %v1847_v47  ;;  %v820_v18 = vsel %vm788_vm12, 1, %v1766_v51  ;;  %v821_v54 = vsel %vm789_vm13, 1, %v1766_v51  ;;  %v991_v0 = vsel %vm895_vm10, 1, %v1766_v51 }
 0x1e8   : > { %vm930_vm4 = vcmp.lt.s32.totalorder %v1880_v3, %v2007_v44  ;;  %v990_v50 = vsel %vm958_vm1, 1, %v1766_v51  ;;  %vm1175_vm8 = vcmp.gt.f32.partialorder %v1127_v5, %v1907_v9  ;;  %v1206_v63 = vsel %vm1174_vm2, 1, %v1766_v51 }
 0x1e9   : > { %vm1281_vm3 = vcmp.eq.f32.partialorder %v1127_v5, %v1907_v9  ;;  %v1207_v19 = vsel %vm1175_vm8, 1, %v1766_v51  ;;  %v1226_v6 = vadd.s32 %v1224_v62, %v1206_v63  ;;  %v837_v22 = vadd.s32 %v2539_v4, %v820_v18 }
 0x1ea   : > { %vm1345_vm0 = vmand %vm1281_vm3, %vm1313_vm15  ;;  %v1247_v35 = vadd.s32 %v1245_v36, %v1207_v19  ;;  %v858_v28 = vadd.s32 %v856_v55, %v821_v54  ;;  %v1007_v2 = vadd.s32 %v1005_v7, %v990_v50  ;;  %v1028_v17 = vadd.s32 %v1026_v61, %v991_v0 }
 0x1eb   : > { %v1377_v53 = vsel %vm1345_vm0, 1, %v1766_v51  ;;  %v2636_v20 = vadd.s32 %v1226_v6, %v1210_v38  ;;  %vm1501_vm15 = vcmask 1042432   ;;  %vm1319_vm2 = vcmp.lt.s32.totalorder %v2626_v49, %v2048_v29 }
 0x1ec   : > { %v1417_v8 = vadd.s32 %v1415_v48, %v1377_v53  ;;  %v2638_v21 = vadd.s32 %v1247_v35, %v1211_v42 }
 0x1ed   : > { %v755_v14 = vpop.permute.xlu0 %754  ;;  %v1152_v52 = vpop.permute.xlu2 %1151 }
 0x1ee   : > { %vm790_vm11 = vcmp.gt.f32.partialorder %v755_v14, %v1847_v47  ;;  %vm791_vm12 = vcmp.gt.f32.partialorder %v755_v14, %v1907_v9  ;;  %vm896_vm13 = vcmp.eq.f32.partialorder %v755_v14, %v1847_v47  ;;  %vm897_vm14 = vcmp.eq.f32.partialorder %v755_v14, %v1907_v9  ;;  %v760_v4 = vpop.permute.xlu1 %759 }
 0x1ef   : > { %v822_v24 = vsel %vm790_vm11, 1, %v1766_v51  ;;  %v823_v26 = vsel %vm791_vm12, 1, %v1766_v51  ;;  %vm960_vm10 = vmand %vm896_vm13, %vm928_vm5  ;;  %v993_v30 = vsel %vm897_vm14, 1, %v1766_v51  ;;  %vm1184_vm1 = vcmp.gt.f32.partialorder %v1152_v52, %v1847_v47 }
 0x1f0   : > { %v838_v55 = vadd.s32 %v2555_v11, %v822_v24  ;;  %v859_v7 = vadd.s32 %v2563_v56, %v823_v26  ;;  %v992_v61 = vsel %vm960_vm10, 1, %v1766_v51  ;;  %v1029_v10 = vadd.s32 %v2570_v23, %v993_v30  ;;  %v1497_v11 = vld.sshfl [vmem:[#allocation1] sm:$0xff pattern:$0x75316420] }
 0x1f1   : > { %v1008_v27 = vadd.s32 %v2567_v60, %v992_v61  ;;  %vm1185_vm7 = vcmp.gt.f32.partialorder %v1152_v52, %v1907_v9  ;;  %v1216_v13 = vsel %vm1184_vm1, 1, %v1766_v51  ;;  %vm1291_vm5 = vcmp.eq.f32.partialorder %v1152_v52, %v1907_v9 }
 0x1f2   : > { %v1217_v16 = vsel %vm1185_vm7, 1, %v1766_v51  ;;  %vm1355_vm9 = vmand %vm1291_vm5, %vm1323_vm6  ;;  %vm792_vm8 = vcmp.gt.f32.partialorder %v760_v4, %v1847_v47  ;;  %vm793_vm3 = vcmp.gt.f32.partialorder %v760_v4, %v1907_v9  ;;  %vm898_vm0 = vcmp.eq.f32.partialorder %v760_v4, %v1847_v47 }
 0x1f3   : > { %v1387_v56 = vsel %vm1355_vm9, 1, %v1766_v51  ;;  %v824_v57 = vsel %vm792_vm8, 1, %v1766_v51  ;;  %v825_v60 = vsel %vm793_vm3, 1, %v1766_v51  ;;  %vm899_vm11 = vcmp.eq.f32.partialorder %v760_v4, %v1907_v9  ;;  %vm962_vm12 = vmand %vm898_vm0, %vm930_vm4 }
 0x1f4   : > { %v839_v23 = vadd.s32 %v837_v22, %v824_v57  ;;  %v860_v25 = vadd.s32 %v858_v28, %v825_v60  ;;  %v994_v33 = vsel %vm962_vm12, 1, %v1766_v51  ;;  %v995_v62 = vsel %vm899_vm11, 1, %v1766_v51 }
 0x1f5   : > { %v1009_v45 = vadd.s32 %v1007_v2, %v994_v33  ;;  %v1030_v36 = vadd.s32 %v1028_v17, %v995_v62  ;;  %v1142_v43 = vpop.permute.xlu0 %1141  ;;  %vm1321_vm6 = vcmp.lt.s32.totalorder %v2633_v58, %v2048_v29  ;;  %v1419_v5 = vadd.s32 %v1417_v8, %v1381_v59 }
 0x1f6   : > { %v1502_v15 = vsel %vm1501_vm15, %v1497_v11, 0.0  ;;  %v840_v37 = vadd.s32 %v839_v23, %v838_v55  ;;  %v861_v48 = vadd.s32 %v860_v25, %v859_v7  ;;  %vm1180_vm13 = vcmp.gt.f32.partialorder %v1142_v43, %v1847_v47  ;;  %v1147_v3 = vpop.permute.xlu1 %1146 }
 0x1f7   : > { %vm1181_vm4 = vcmp.gt.f32.partialorder %v1142_v43, %v1907_v9  ;;  %v1010_v44 = vadd.s32 %v1009_v45, %v1008_v27  ;;  %v1031_v38 = vadd.s32 %v1030_v36, %v1029_v10  ;;  %v1212_v46 = vsel %vm1180_vm13, 1, %v1766_v51  ;;  %v1498_v27 = vld.sshfl [vmem:[#allocation1 + $0x8] sm:$0xff pattern:$0x75316420] }
 0x1f8   : > { %v1213_v42 = vsel %vm1181_vm4, 1, %v1766_v51  ;;  %v841_v18 = vrot.slane %v840_v37, 4  ;;  %v862_v54 = vrot.slane %v861_v48, 4  ;;  %v1229_v0 = vadd.s32 %v2575_v31, %v1212_v46 }
 0x1f9   : > { %v1250_v50 = vadd.s32 %v2577_v34, %v1213_v42  ;;  %v1011_v63 = vrot.slane %v1010_v44, 4  ;;  %v1032_v19 = vrot.slane %v1031_v38, 4  ;;  %vm1287_vm14 = vcmp.eq.f32.partialorder %v1142_v43, %v1907_v9 }
 0x1fa   : > { %vm1182_vm10 = vcmp.gt.f32.partialorder %v1147_v3, %v1847_v47  ;;  %v842_v6 = vadd.s32 %v841_v18, %v840_v37  ;;  %v863_v12 = vadd.s32 %v862_v54, %v861_v48  ;;  %v1231_v59 = vadd.s32 %v1229_v0, %v1216_v13  ;;  %vm1351_vm1 = vmand %vm1287_vm14, %vm1319_vm2  ;;  %v1755_v0 = vld [vmem:[%s1832_s30] sm:$0x3] }
 0x1fb   : > { %v1252_v35 = vadd.s32 %v1250_v50, %v1217_v16  ;;  %v1012_v53 = vadd.s32 %v1011_v63, %v1010_v44  ;;  %v1033_v22 = vadd.s32 %v1032_v19, %v1031_v38  ;;  %v1383_v31 = vsel %vm1351_vm1, 1, %v1766_v51 }
 0x1fc   : > { %vm1183_vm7 = vcmp.gt.f32.partialorder %v1147_v3, %v1907_v9  ;;  %v843_v34 = vrot.slane %v842_v6, 2  ;;  %v864_v28 = vrot.slane %v863_v12, 2  ;;  %v1420_v2 = vadd.s32 %v2579_v32, %v1383_v31 }
 0x1fd   : > { %v1214_v47 = vsel %vm1182_vm10, 1, %v1766_v51  ;;  %v1013_v17 = vrot.slane %v1012_v53, 2  ;;  %v1034_v8 = vrot.slane %v1033_v22, 2  ;;  %v1215_v14 = vsel %vm1183_vm7, 1, %v1766_v51 }
 0x1fe   : > { %v1230_v52 = vadd.s32 %v2636_v20, %v1214_v47  ;;  %v844_v49 = vadd.s32 %v843_v34, %v842_v6  ;;  %v865_v4 = vadd.s32 %v864_v28, %v863_v12  ;;  %v1422_v24 = vadd.s32 %v1420_v2, %v1387_v56  ;;  %v1756_v2 = vld [vmem:[%s1823_s26] sm:$0xff] }
 0x1ff   : > { %v1251_v26 = vadd.s32 %v2638_v21, %v1215_v14  ;;  %v1014_v30 = vadd.s32 %v1013_v17, %v1012_v53  ;;  %v1035_v55 = vadd.s32 %v1034_v8, %v1033_v22  ;;  %vm1289_vm2 = vcmp.eq.f32.partialorder %v1147_v3, %v1907_v9 }
 0x200   : > { %v1232_v7 = vadd.s32 %v1231_v59, %v1230_v52  ;;  %v845_v61 = vrot.slane %v844_v49, 1  ;;  %v866_v32 = vrot.slane %v865_v4, 1  ;;  %vm1353_vm5 = vmand %vm1289_vm2, %vm1321_vm6  ;;  %v1503_v13 = vrot.slane %v1502_v15, 4  ;;  %v1757_v52 = vld [vmem:[%s1823_s26 + $0x8] sm:$0xff] }
 0x201   : > { %v1253_v10 = vadd.s32 %v1252_v35, %v1251_v26  ;;  %v1015_v20 = vrot.slane %v1014_v30, 1  ;;  %v1036_v16 = vrot.slane %v1035_v55, 1  ;;  %v1385_v56 = vsel %vm1353_vm5, 1, %v1766_v51 }
 0x202   : > { %v1233_v11 = vrot.slane %v1232_v7, 4  ;;  %v846_v21 = vadd.s32 %v845_v61, %v844_v49  ;;  %v867_v57 = vadd.s32 %v866_v32, %v865_v4  ;;  %v1421_v23 = vadd.s32 %v1419_v5, %v1385_v56 }
 0x203   : > { %v1254_v60 = vrot.slane %v1253_v10, 4  ;;  %v1016_v25 = vadd.s32 %v1015_v20, %v1014_v30  ;;  %v1037_v9 = vadd.s32 %v1036_v16, %v1035_v55  ;;  %v1504_v62 = vadd.f32 %v1503_v13, %v1502_v15 }
 0x204   : > { %v1234_v33 = vadd.s32 %v1233_v11, %v1232_v7  ;;  %v1423_v36 = vadd.s32 %v1422_v24, %v1421_v23  ;;  %v1509_v29 = vsel %vm1501_vm15, %v1498_v27, 0.0  ;;  %v1403_v58 = vrot.slane %v1766_v51, 4 }
 0x205   : > { %v1255_v45 = vadd.s32 %v1254_v60, %v1253_v10  ;;  %v1039_v43 = vadd.s32 %v1037_v9, %v867_v57  ;;  %v1505_v48 = vrot.slane %v1504_v62, 2  ;;  %v1510_v3 = vrot.slane %v1509_v29, 4 }
 0x206   : > { %v1235_v37 = vrot.slane %v1234_v33, 2  ;;  %v1424_v38 = vrot.slane %v1423_v36, 4  ;;  %v1038_v46 = vadd.s32 %v1016_v25, %v846_v21  ;;  %v1405_v42 = vrot.slane %v1403_v58, 2 }
 0x207   : > { %v1256_v44 = vrot.slane %v1255_v45, 2  ;;  %v1506_v18 = vadd.f32 %v1505_v48, %v1504_v62  ;;  %v1511_v54 = vadd.f32 %v1510_v3, %v1509_v29  ;;  %v1443_v15 = vperm.slane %v1755_v0, 0 }
 0x208   : > { %v1236_v5 = vadd.s32 %v1235_v37, %v1234_v33  ;;  %v1425_v63 = vadd.s32 %v1424_v38, %v1423_v36  ;;  %v1406_v19 = vadd.s32 %v1405_v42, %v1403_v58  ;;  %v1444_v6 = vperm.slane %v1755_v0, 1 }
 0x209   : > { %v1257_v50 = vadd.s32 %v1256_v44, %v1255_v45  ;;  %v1512_v59 = vrot.slane %v1511_v54, 2  ;;  %vm1445_vm15 = vcmp.eq.s32.totalorder %v1811_v1, %v1443_v15  ;;  %v1507_v34 = vrot.slane %v1506_v18, 1 }
 0x20a   : > { %v1237_v12 = vrot.slane %v1236_v5, 1  ;;  %v1426_v53 = vrot.slane %v1425_v63, 2  ;;  %v1407_v22 = vrot.slane %v1406_v19, 1  ;;  %vm1446_vm9 = vcmp.eq.s32.totalorder %v1811_v1, %v1444_v6 }
 0x20b   : > { %v1258_v35 = vrot.slane %v1257_v50, 1  ;;  %v1513_v28 = vadd.f32 %v1512_v59, %v1511_v54  ;;  %v1447_v47 = vsel %vm1445_vm15, %v1756_v2, 0.0  ;;  %v1448_v49 = vsel %vm1446_vm9, %v1757_v52, 0.0 }
 0x20c   : > { %v1238_v31 = vadd.s32 %v1237_v12, %v1236_v5  ;;  %v1427_v8 = vadd.s32 %v1426_v53, %v1425_v63  ;;  %v1408_v14 = vadd.s32 %v1407_v22, %v1406_v19  ;;  %v1449_v26 = vrot.slane %v1447_v47, 4 }
 0x20d   : > { %v1259_v17 = vadd.s32 %v1258_v35, %v1257_v50  ;;  %v1514_v4 = vrot.slane %v1513_v28, 1  ;;  %v1455_v30 = vrot.slane %v1448_v49, 4  ;;  %v1508_v61 = vadd.f32 %v1507_v34, %v1506_v18 }
 0x20e   : > { %v1430_v24 = vadd.s32 %v1238_v31, %v1038_v46  ;;  %v1428_v55 = vrot.slane %v1427_v8, 1  ;;  %v1450_v32 = vadd.f32 %v1449_v26, %v1447_v47  ;;  %v1434_v21 = vstv %s390_s19 }
 0x20f   : > { %v1431_v7 = vadd.s32 %v1259_v17, %v1039_v43  ;;  %v1515_v1 = vadd.f32 %v1514_v4, %v1513_v28  ;;  %v1456_v10 = vadd.f32 %v1455_v30, %v1448_v49  ;;  %vm2759_vm8 = vcmask 1040384  }
 0x210   : > { %v1429_v27 = vadd.s32 %v1428_v55, %v1427_v8  ;;  %v1432_v13 = vadd.s32 %v1430_v24, %v1408_v14  ;;  %v1451_v16 = vrot.slane %v1450_v32, 2  ;;  %vm2760_vm3 = vcmp.gt.s32.totalorder %v1839_v41, 0  ;;  %vm2761_vm12 = vmmov %vm2759_vm8 }
 0x211   : > { %v1518_v20 = vrot.slane %v1515_v1, 7  ;;  %v1457_v11 = vrot.slane %v1456_v10, 2  ;;  %vm2762_vm6 = vmmov %vm2759_vm8  ;;  %vm2768_vm5 = vcmask 0  }
 0x212   : > { %v1433_v56 = vadd.s32 %v1431_v7, %v1429_v27  ;;  %v1452_v60 = vadd.f32 %v1451_v16, %v1450_v32  ;;  %vm1435_vm0 = vcmp.lt.s32.totalorder %v1432_v13, %v1434_v21  ;;  %vm2763_vm13 = vmmov %vm2762_vm6 }
 0x213   : > { %v1519_v57 = vsel %vm2759_vm8, %v1508_v61, %v1518_v20  ;;  %v1458_v23 = vadd.f32 %v1457_v11, %v1456_v10  ;;  %v1437_v37 = vsel %vm1435_vm0, 1, %v1766_v51  ;;  %vm2764_vm14 = vmmov %vm2760_vm3 }
 0x214   : > { %v1521_v25 = vsel %vm2760_vm3, %v1519_v57, 0.0  ;;  %vm1436_vm11 = vcmp.lt.s32.totalorder %v1433_v56, %v1434_v21  ;;  %v1453_v45 = vrot.slane %v1452_v60, 1  ;;  %vm2765_vm1 = vmmov %vm2762_vm6 }
 0x215   : > { %v1523_v9 = vperm.slane %v1521_v25, 0  ;;  %v1524_v33 = vperm.slane %v1521_v25, 1  ;;  %v1438_v62 = vsel %vm1436_vm11, 1, %v1766_v51  ;;  %v1459_v29 = vrot.slane %v1458_v23, 1  ;;  %vm2766_vm7 = vmmov %vm2765_vm1 }
 0x216   : > { %v1439_v36 = vrot.slane %v1438_v62, 7  ;;  %v1454_v48 = vadd.f32 %v1453_v45, %v1452_v60  ;;  %vm2767_vm2 = vmmov %vm2765_vm1 }
 0x217   : > { %v1527_v58 = vsel %vm2761_vm12, %v1523_v9, 0.0  ;;  %v1528_v43 = vsel %vm2762_vm6, %v1524_v33, 0.0  ;;  %v1460_v38 = vadd.f32 %v1459_v29, %v1458_v23  ;;  %vm2769_vm15 = vmmov %vm2768_vm5 }
 0x218   : > { %v1529_v3 = vadd.f32 %v1528_v43, %v1527_v58  ;;  %v1440_v44 = vsel %vm2763_vm13, %v1437_v37, %v1439_v36  ;;  %v1461_v46 = vsub.f32 %v1834_v39, %v1454_v48 }
 0x219   : > { %vm1441_vm4 = vcmp.ne.s32.totalorder %v1440_v44, 0  ;;  %v1462_v42 = vsub.f32 %v1836_v40, %v1460_v38 }
 0x21a   : > { %1530 = vadd.xlane.f32.xlu1 %v1529_v3  ;;  %vm1442_vm10 = vmor %vm2764_vm14, %vm1441_vm4 }
 0x21b   : > { %v1465_v5 = vrot.slane %v1462_v42, 7 }
 0x21d   : > { %v1466_v18 = vsel %vm2765_vm1, %v1461_v46, %v1465_v5 }
 0x21e   : > { %v1468_v54 = vsel %vm1442_vm10, %v1466_v18, 0.0 }
 0x21f   : > { %v1470_v0 = vperm.slane %v1468_v54, 0  ;;  %v1471_v51 = vperm.slane %v1468_v54, 1 }
 0x221   : > { %v1474_v15 = vsel %vm2766_vm7, %v1470_v0, 0.0  ;;  %v1475_v50 = vsel %vm2767_vm2, %v1471_v51, 0.0 }
 0x222   : > { %v1476_v63 = vadd.f32 %v1475_v50, %v1474_v15 }
 0x224   : > { %1477 = vadd.xlane.f32.xlu0 %v1476_v63 }
 0x28d   : > { %v1531_v19 = vpop.xlane.xlu1 %1530 }
 0x28e   : > { %v1532_v39 = vrot.slane %v1531_v19, 4 }
 0x290   : > { %v1533_v6 = vadd.f32 %v1532_v39, %v1531_v19 }
 0x292   : > { %v1534_v40 = vrot.slane %v1533_v6, 2 }
 0x294   : > { %v1535_v35 = vadd.f32 %v1534_v40, %v1533_v6 }
 0x296   : > { %v1536_v31 = vrot.slane %v1535_v35, 1 }
 0x297   : > { %v1478_v41 = vpop.xlane.xlu0 %1477 }
 0x298   : > { %v1479_v12 = vrot.slane %v1478_v41, 4  ;;  %v1537_v2 = vadd.f32 %v1536_v31, %v1535_v35 }
 0x29a   : > { %v1480_v59 = vadd.f32 %v1479_v12, %v1478_v41 }
 0x29c   : > { %v1481_v53 = vrot.slane %v1480_v59, 2 }
 0x29e   : > { %v1482_v22 = vadd.f32 %v1481_v53, %v1480_v59 }
 0x2a0   : > { %v1483_v34 = vrot.slane %v1482_v22, 1 }
 0x2a2   : > { %v1484_v28 = vadd.f32 %v1483_v34, %v1482_v22 }
 0x2a4   : > { %1700 = vpush %v1484_v28 }
 0x2a5   : > { %1702 = vpush %v1537_v2 }
 0x2d5   : > { %s1701_s25 = spop %1700 }
 0x2d6   : > { %v1542_v47 = vstv %s1701_s25  ;;  %s1703_s29 = spop %1702 }
 0x2d7   : > { %1543 = vst.msk [vmem:[%s318_s24] sm:$0x1] %vm2768_vm5, %v1542_v47  ;;  %v1539_v17 = vstv %s1703_s29 }
 0x2d8   : > { %1541 = vst.msk [vmem:[%s315_s28] sm:$0x1] %vm2769_vm15, %v1539_v17 }
 0x2d9 PF: > { %s17_s21 = sadd.s32 1, %s1764_s21  }
 0x2da   : > { %p14_p4 = scmp.ge.s32.totalorder %s17_s21, 4  }
 0x2dc   :  { %16 = sbr.rel (!%p14_p4) target bundleno = 1 (0x1), region = 100 }

</bundles_post_ra>
